<compile_context>
chip_gen: v6e
topology: v6e:2x2x1
jax: 0.10.0
libtpu: 0.0.40
codegen_flags: <defaults>
</compile_context>

<pallas_src>
import jax
import jax.numpy as jnp
from jax.experimental import pallas as pl
from jax.experimental.pallas import tpu as pltpu

# ---------------- small synthetic config (stands in for ViT-B/16) ----------
B = 2
C = 3
IMG_H = 16
IMG_W = 16
PATCH = 8
GH, GW = IMG_H // PATCH, IMG_W // PATCH
NPATCH = GH * GW
SEQ = NPATCH + 1            # +1 for CLS token (real model: 197)
SEQ_PAD = 8                 # padded to sublane multiple (real model: 256)
D = 32                      # stands in for in_planes = 768
D_PROJ = 16                 # stands in for in_planes_proj = 512
HEADS = 4
HDIM = D // HEADS
MLP = 4 * D
LAYERS = 2                  # stands in for 12 transformer blocks
LN_EPS = 1e-5
BN_EPS = 1e-5
CPP = C * PATCH * PATCH     # flattened patch length (channel-major)


# ---------------- BlockSpec helpers -----------------------------------------
def _const_spec(shape):
    nd = len(shape)
    return pl.BlockSpec(tuple(shape), lambda l, _n=nd: (0,) * _n)


def _layer_spec(shape):
    nd = len(shape)
    return pl.BlockSpec((1,) + tuple(shape), lambda l, _n=nd: (l,) + (0,) * _n)


# ---------------- the fused kernel -------------------------------------------
def transreid_kernel(patches_ref, patchw_ref, clspos_ref, lnpre_ref,
                     ln1_ref, wqkv_ref, bqkv_ref, wo_ref, bo_ref,
                     ln2_ref, wfc1_ref, bfc1_ref, wfc2_ref, bfc2_ref,
                     lnpost_ref, proj_ref, bn_ref, bnp_ref,
                     out_ref, x_scr):
    l = pl.program_id(0)
    f32 = jnp.float32
    bf16 = jnp.bfloat16

    # padding masks (computed from 2-D iota; SEQ_PAD is a power of two)
    kidx = jax.lax.broadcasted_iota(jnp.int32, (SEQ_PAD, SEQ_PAD), 1)
    key_mask = jnp.where(kidx < SEQ, 0.0, -1e30).astype(f32)
    ridx = jax.lax.broadcasted_iota(jnp.int32, (B * SEQ_PAD, D), 0)
    row_mask = jnp.where((ridx & (SEQ_PAD - 1)) < SEQ, 1.0, 0.0).astype(f32)

    def _ln(v, g, b):
        mu = jnp.mean(v, axis=-1, keepdims=True)
        c = v - mu
        var = jnp.mean(c * c, axis=-1, keepdims=True)
        return c * jax.lax.rsqrt(var + LN_EPS) * g + b

    # ---- layer 0: patch projection + CLS/pos assembly + ln_pre -------------
    @pl.when(l == 0)
    def _init():
        tok = jnp.dot(patches_ref[...].astype(bf16), patchw_ref[...],
                      preferred_element_type=f32)              # [B*NPATCH, D]
        x_scr[...] = jnp.zeros_like(x_scr)
        for b in range(B):
            r0 = b * SEQ_PAD
            x_scr[r0:r0 + 1, :] = clspos_ref[0:1, :]           # CLS + pos[0]
            x_scr[r0 + 1:r0 + SEQ, :] = (tok[b * NPATCH:(b + 1) * NPATCH, :]
                                         + clspos_ref[1:SEQ, :])
        x_scr[...] = _ln(x_scr[...], lnpre_ref[0:1, :],
                         lnpre_ref[1:2, :]) * row_mask

    x = x_scr[...]                                             # [B*SEQ_PAD, D]

    # ---- multi-head self-attention (pre-LN), residual fused -----------------
    ln1v = ln1_ref[0]
    hn = _ln(x, ln1v[0:1, :], ln1v[1:2, :])
    qkv = jnp.dot(hn.astype(bf16), wqkv_ref[0],
                  preferred_element_type=f32) + bqkv_ref[0]    # [B*SEQ_PAD, 3D]
    scale = 1.0 / float(HDIM) ** 0.5
    heads = []
    for h in range(HEADS):
        c0 = h * HDIM
        # f32 reshapes only split the (sublane-aligned) leading dim; cast to
        # bf16 afterwards so the MXU sees bf16 operands with f32 accumulation.
        q = qkv[:, c0:c0 + HDIM].reshape(B, SEQ_PAD, HDIM).astype(bf16)
        k = qkv[:, D + c0:D + c0 + HDIM].reshape(B, SEQ_PAD, HDIM).astype(bf16)
        v = qkv[:, 2 * D + c0:2 * D + c0 + HDIM].reshape(B, SEQ_PAD,
                                                         HDIM).astype(bf16)
        s = jnp.einsum('bqd,bkd->bqk', q, k,
                       preferred_element_type=f32) * scale     # [B, S, S]
        s = s + key_mask
        s = s - jnp.max(s, axis=-1, keepdims=True)
        p = jnp.exp(s)
        p = p * pl.reciprocal(jnp.sum(p, axis=-1, keepdims=True), approx=True)
        heads.append(jnp.einsum('bqk,bkd->bqd', p.astype(bf16), v,
                                preferred_element_type=f32))   # [B, S, HDIM]
    att = jnp.concatenate(heads, axis=-1).reshape(B * SEQ_PAD, D)
    x = x + jnp.dot(att.astype(bf16), wo_ref[0],
                    preferred_element_type=f32) + bo_ref[0]

    # ---- MLP (pre-LN) with QuickGELU, residual fused -------------------------
    ln2v = ln2_ref[0]
    hn2 = _ln(x, ln2v[0:1, :], ln2v[1:2, :])
    mid = jnp.dot(hn2.astype(bf16), wfc1_ref[0],
                  preferred_element_type=f32) + bfc1_ref[0]    # [B*SEQ_PAD, MLP]
    mid = mid * jax.nn.sigmoid(1.702 * mid)                    # QuickGELU (f32)
    x = x + jnp.dot(mid.astype(bf16), wfc2_ref[0],
                    preferred_element_type=f32) + bfc2_ref[0]
    x = x * row_mask                                           # keep pad rows 0
    x_scr[...] = x

    # ---- head at last layer: ln_post + proj + BN + concat + L2-normalize ----
    @pl.when(l == LAYERS - 1)
    def _head():
        # extract CLS rows first, then LN only those B rows (LN is per-row).
        cls_rows = jnp.concatenate(
            [x[b * SEQ_PAD:b * SEQ_PAD + 1, :] for b in range(B)], axis=0)
        cls_f = _ln(cls_rows, lnpost_ref[0:1, :], lnpost_ref[1:2, :])  # [B, D]
        cls_p = jnp.dot(cls_f.astype(bf16), proj_ref[...],
                        preferred_element_type=f32)                    # [B, Dp]
        g1, b1 = bn_ref[0:1, :], bn_ref[1:2, :]
        m1, v1 = bn_ref[2:3, :], bn_ref[3:4, :]
        g2, b2 = bnp_ref[0:1, :], bnp_ref[1:2, :]
        m2, v2 = bnp_ref[2:3, :], bnp_ref[3:4, :]
        # TODO(synk): torch BatchNorm1d defaults to training-mode batch stats;
        # inference/running-stats mode is implemented here.
        f1 = (cls_f - m1) * jax.lax.rsqrt(v1 + BN_EPS) * g1 + b1
        f2 = (cls_p - m2) * jax.lax.rsqrt(v2 + BN_EPS) * g2 + b2
        o = jnp.concatenate([f1, f2], axis=1)                  # [B, D+Dp]
        nrm2 = jnp.sum(o * o, axis=1, keepdims=True)
        out_ref[...] = o * jax.lax.rsqrt(jnp.maximum(nrm2, 1e-24))


# ---------------- parameters (deterministic synthetic init) -----------------
def init_params(key):
    keys = jax.random.split(key, 32)
    kit = iter(keys)

    def nrm(shape, scale=0.02):
        return (scale * jax.random.normal(next(kit), shape)).astype(jnp.float32)

    def ln_pair(d):
        return jnp.stack([jnp.ones((d,), jnp.float32),
                          jnp.zeros((d,), jnp.float32)])

    p = {}
    # conv1 weight [D, C, p, p] (bias=False, frozen) -> math layout [C*p*p, D]
    p["patch_w"] = nrm((CPP, D))
    p["cls"] = nrm((D,))
    p["pos"] = nrm((SEQ, D))
    p["ln_pre"] = ln_pair(D)
    # per-layer weights stacked with a leading LAYERS axis
    p["ln1"] = jnp.stack([ln_pair(D) for _ in range(LAYERS)])     # [L, 2, D]
    p["w_qkv"] = nrm((LAYERS, D, 3 * D))
    p["b_qkv"] = jnp.zeros((LAYERS, 1, 3 * D), jnp.float32)
    p["w_o"] = nrm((LAYERS, D, D))
    p["b_o"] = jnp.zeros((LAYERS, 1, D), jnp.float32)
    p["ln2"] = jnp.stack([ln_pair(D) for _ in range(LAYERS)])
    p["w_fc1"] = nrm((LAYERS, D, MLP))
    p["b_fc1"] = jnp.zeros((LAYERS, 1, MLP), jnp.float32)
    p["w_fc2"] = nrm((LAYERS, MLP, D))
    p["b_fc2"] = jnp.zeros((LAYERS, 1, D), jnp.float32)
    p["ln_post"] = ln_pair(D)
    p["proj"] = nrm((D, D_PROJ))
    # BatchNorm1d bottlenecks (kaiming init: weight=1, bias=0, bias frozen);
    # rows = [gamma, beta, running_mean, running_var].
    p["bn"] = jnp.stack([jnp.ones((D,)), jnp.zeros((D,)),
                         jnp.zeros((D,)), jnp.ones((D,))]).astype(jnp.float32)
    p["bn_proj"] = jnp.stack([jnp.ones((D_PROJ,)), jnp.zeros((D_PROJ,)),
                              jnp.zeros((D_PROJ,)),
                              jnp.ones((D_PROJ,))]).astype(jnp.float32)
    return p


# ---------------- forward -----------------------------------------------------
def patchify(x):
    # NCHW -> [B*num_patches, C*p*p], channel-major like torch conv-weight flatten
    xb = x.reshape(B, C, GH, PATCH, GW, PATCH)
    xb = xb.transpose(0, 2, 4, 1, 3, 5)       # [B, GH, GW, C, p, p]
    return xb.reshape(B * NPATCH, CPP)


def transreid_forward(params, x):
    patches = patchify(x.astype(jnp.float32))
    # fold CLS token into the positional table row 0 (added to row 0 only)
    cls_pos = params["pos"].at[0].add(params["cls"])
    bf = jnp.bfloat16

    in_specs = [
        _const_spec((B * NPATCH, CPP)),    # patches
        _const_spec((CPP, D)),             # patch_w (bf16)
        _const_spec((SEQ, D)),             # cls_pos
        _const_spec((2, D)),               # ln_pre
        _layer_spec((2, D)),               # ln1
        _layer_spec((D, 3 * D)),           # w_qkv (bf16)
        _layer_spec((1, 3 * D)),           # b_qkv
        _layer_spec((D, D)),               # w_o (bf16)
        _layer_spec((1, D)),               # b_o
        _layer_spec((2, D)),               # ln2
        _layer_spec((D, MLP)),             # w_fc1 (bf16)
        _layer_spec((1, MLP)),             # b_fc1
        _layer_spec((MLP, D)),             # w_fc2 (bf16)
        _layer_spec((1, D)),               # b_fc2
        _const_spec((2, D)),               # ln_post
        _const_spec((D, D_PROJ)),          # proj (bf16)
        _const_spec((4, D)),               # bn
        _const_spec((4, D_PROJ)),          # bn_proj
    ]

    return pl.pallas_call(
        transreid_kernel,
        out_shape=jax.ShapeDtypeStruct((B, D + D_PROJ), jnp.float32),
        grid=(LAYERS,),
        in_specs=in_specs,
        out_specs=pl.BlockSpec((B, D + D_PROJ), lambda l: (0, 0)),
        scratch_shapes=[pltpu.VMEM((B * SEQ_PAD, D), jnp.float32)],  # resident x
        compiler_params=pltpu.CompilerParams(
            dimension_semantics=("arbitrary",)),
    )(patches, params["patch_w"].astype(bf), cls_pos, params["ln_pre"],
      params["ln1"], params["w_qkv"].astype(bf), params["b_qkv"],
      params["w_o"].astype(bf), params["b_o"],
      params["ln2"], params["w_fc1"].astype(bf), params["b_fc1"],
      params["w_fc2"].astype(bf), params["b_fc2"],
      params["ln_post"], params["proj"].astype(bf),
      params["bn"], params["bn_proj"])


if __name__ == "__main__":
    key = jax.random.PRNGKey(0)
    pkey, xkey = jax.random.split(key)
    params = init_params(pkey)
    x = jax.random.normal(xkey, (B, C, IMG_H, IMG_W), dtype=jnp.float32)

    out = jax.jit(transreid_forward)(params, x)
    out = jax.block_until_ready(out)

    assert out.shape == (B, D + D_PROJ), out.shape
    assert bool(jnp.all(jnp.isfinite(out))), "non-finite output"
    norms = jnp.linalg.norm(out, axis=1)
    assert bool(jnp.all(jnp.abs(norms - 1.0) < 1e-4)), norms
    print("KERNEL_OK")
</pallas_src>

<mosaic_0001>
module attributes {stable_mosaic.version = 11 : i64} {
  func.func @transreid_kernel(%arg0: i32, %arg1: memref<8x192xf32, #tpu.memory_space<vmem>>, %arg2: memref<192x32xbf16, #tpu.memory_space<vmem>>, %arg3: memref<5x32xf32, #tpu.memory_space<vmem>>, %arg4: memref<2x32xf32, #tpu.memory_space<vmem>>, %arg5: memref<1x2x32xf32, #tpu.memory_space<vmem>>, %arg6: memref<1x32x96xbf16, #tpu.memory_space<vmem>>, %arg7: memref<1x1x96xf32, #tpu.memory_space<vmem>>, %arg8: memref<1x32x32xbf16, #tpu.memory_space<vmem>>, %arg9: memref<1x1x32xf32, #tpu.memory_space<vmem>>, %arg10: memref<1x2x32xf32, #tpu.memory_space<vmem>>, %arg11: memref<1x32x128xbf16, #tpu.memory_space<vmem>>, %arg12: memref<1x1x128xf32, #tpu.memory_space<vmem>>, %arg13: memref<1x128x32xbf16, #tpu.memory_space<vmem>>, %arg14: memref<1x1x32xf32, #tpu.memory_space<vmem>>, %arg15: memref<2x32xf32, #tpu.memory_space<vmem>>, %arg16: memref<32x16xbf16, #tpu.memory_space<vmem>>, %arg17: memref<4x32xf32, #tpu.memory_space<vmem>>, %arg18: memref<4x16xf32, #tpu.memory_space<vmem>>, %arg19: memref<2x48xf32, #tpu.memory_space<vmem>>, %arg20: memref<16x32xf32, #tpu.memory_space<vmem>>) attributes {dimension_semantics = [#tpu.dimension_semantics<arbitrary>], iteration_bounds = array<i64: 2>, scalar_prefetch = 0 : i64, scratch_operands = 1 : i64, tpu.core_type = #tpu.core_type<tc>, window_params = [{pipeline_mode = #tpu.pipeline_mode<synchronous>, transform_indices = @transform_0, window_bounds = array<i64: 8, 192>}, {pipeline_mode = #tpu.pipeline_mode<synchronous>, transform_indices = @transform_1, window_bounds = array<i64: 192, 32>}, {pipeline_mode = #tpu.pipeline_mode<synchronous>, transform_indices = @transform_2, window_bounds = array<i64: 5, 32>}, {pipeline_mode = #tpu.pipeline_mode<synchronous>, transform_indices = @transform_3, window_bounds = array<i64: 2, 32>}, {transform_indices = @transform_4, window_bounds = array<i64: 1, 2, 32>}, {transform_indices = @transform_5, window_bounds = array<i64: 1, 32, 96>}, {transform_indices = @transform_6, window_bounds = array<i64: 1, 1, 96>}, {transform_indices = @transform_7, window_bounds = array<i64: 1, 32, 32>}, {transform_indices = @transform_8, window_bounds = array<i64: 1, 1, 32>}, {transform_indices = @transform_9, window_bounds = array<i64: 1, 2, 32>}, {transform_indices = @transform_10, window_bounds = array<i64: 1, 32, 128>}, {transform_indices = @transform_11, window_bounds = array<i64: 1, 1, 128>}, {transform_indices = @transform_12, window_bounds = array<i64: 1, 128, 32>}, {transform_indices = @transform_13, window_bounds = array<i64: 1, 1, 32>}, {pipeline_mode = #tpu.pipeline_mode<synchronous>, transform_indices = @transform_14, window_bounds = array<i64: 2, 32>}, {pipeline_mode = #tpu.pipeline_mode<synchronous>, transform_indices = @transform_15, window_bounds = array<i64: 32, 16>}, {pipeline_mode = #tpu.pipeline_mode<synchronous>, transform_indices = @transform_16, window_bounds = array<i64: 4, 32>}, {pipeline_mode = #tpu.pipeline_mode<synchronous>, transform_indices = @transform_17, window_bounds = array<i64: 4, 16>}, {pipeline_mode = #tpu.pipeline_mode<synchronous>, transform_indices = @transform_18, window_bounds = array<i64: 2, 48>}]} {
    %0 = tpu.iota {dimensions = array<i32: 1>} : vector<8x8xi32>
    %c5_i32 = arith.constant 5 : i32
    %1 = vector.broadcast %c5_i32 : i32 to vector<8x8xi32>
    %2 = arith.cmpi slt, %0, %1 : vector<8x8xi32>
    %cst = arith.constant 0.000000e+00 : f32
    %cst_0 = arith.constant -1.000000e+30 : f32
    %3 = vector.broadcast %cst : f32 to vector<8x8xf32>
    %4 = vector.broadcast %cst_0 : f32 to vector<8x8xf32>
    %5 = arith.select %2, %3, %4 : vector<8x8xi1>, vector<8x8xf32>
    %6 = tpu.iota {dimensions = array<i32: 0>} : vector<16x32xi32>
    %c7_i32 = arith.constant 7 : i32
    %7 = vector.broadcast %c7_i32 : i32 to vector<16x32xi32>
    %8 = arith.andi %6, %7 : vector<16x32xi32>
    %c5_i32_1 = arith.constant 5 : i32
    %9 = vector.broadcast %c5_i32_1 : i32 to vector<16x32xi32>
    %10 = arith.cmpi slt, %8, %9 : vector<16x32xi32>
    %cst_2 = arith.constant 1.000000e+00 : f32
    %cst_3 = arith.constant 0.000000e+00 : f32
    %11 = vector.broadcast %cst_2 : f32 to vector<16x32xf32>
    %12 = vector.broadcast %cst_3 : f32 to vector<16x32xf32>
    %13 = arith.select %10, %11, %12 : vector<16x32xi1>, vector<16x32xf32>
    %c0_i32 = arith.constant 0 : i32
    %14 = arith.cmpi eq, %arg0, %c0_i32 : i32
    %15 = arith.extui %14 : i1 to i32
    %c0_i32_4 = arith.constant 0 : i32
    %16 = arith.cmpi ne, %15, %c0_i32_4 : i32
    scf.if %16 {
      %c0_75 = arith.constant 0 : index
      %c0_76 = arith.constant 0 : index
      %223 = vector.load %arg1[%c0_75, %c0_76] : memref<8x192xf32, #tpu.memory_space<vmem>>, vector<8x192xf32>
      %224 = arith.truncf %223 : vector<8x192xf32> to vector<8x192xbf16>
      %c0_77 = arith.constant 0 : index
      %c0_78 = arith.constant 0 : index
      %225 = vector.load %arg2[%c0_77, %c0_78] : memref<192x32xbf16, #tpu.memory_space<vmem>>, vector<192x32xbf16>
      %cst_79 = arith.constant dense<0.000000e+00> : vector<8x32xf32>
      %226 = tpu.matmul %224, %225, %cst_79 {dimension_numbers = #tpu.dot_dimension_numbers<[1], [0], [0], [1], [0, 0, 1, 1], [], []>} : vector<8x192xbf16>, vector<192x32xbf16>, vector<8x32xf32> -> vector<8x32xf32>
      %cst_80 = arith.constant 0.000000e+00 : f32
      %227 = vector.broadcast %cst_80 : f32 to vector<16x32xf32>
      %c0_81 = arith.constant 0 : index
      %c0_82 = arith.constant 0 : index
      %228 = vector.load %arg20[%c0_81, %c0_82] : memref<16x32xf32, #tpu.memory_space<vmem>>, vector<16x32xf32>
      tpu.vector_store %arg20[%c0_81, %c0_82], %227 {strides = array<i32>} : memref<16x32xf32, #tpu.memory_space<vmem>>, vector<16x32xf32>,
      %c0_83 = arith.constant 0 : index
      %c0_84 = arith.constant 0 : index
      %229 = vector.load %arg3[%c0_83, %c0_84] : memref<5x32xf32, #tpu.memory_space<vmem>>, vector<1x32xf32>
      %c0_85 = arith.constant 0 : index
      %c0_86 = arith.constant 0 : index
      %230 = vector.load %arg20[%c0_85, %c0_86] : memref<16x32xf32, #tpu.memory_space<vmem>>, vector<1x32xf32>
      tpu.vector_store %arg20[%c0_85, %c0_86], %229 {strides = array<i32>} : memref<16x32xf32, #tpu.memory_space<vmem>>, vector<1x32xf32>,
      %231 = vector.extract_strided_slice %226 {offsets = [0, 0], sizes = [4, 32], strides = [1, 1]} : vector<8x32xf32> to vector<4x32xf32>
      %c1 = arith.constant 1 : index
      %c0_87 = arith.constant 0 : index
      %232 = vector.load %arg3[%c1, %c0_87] : memref<5x32xf32, #tpu.memory_space<vmem>>, vector<4x32xf32>
      %233 = arith.addf %231, %232 : vector<4x32xf32>
      %c1_88 = arith.constant 1 : index
      %c0_89 = arith.constant 0 : index
      %234 = vector.load %arg20[%c1_88, %c0_89] : memref<16x32xf32, #tpu.memory_space<vmem>>, vector<4x32xf32>
      tpu.vector_store %arg20[%c1_88, %c0_89], %233 {strides = array<i32>} : memref<16x32xf32, #tpu.memory_space<vmem>>, vector<4x32xf32>,
      %c0_90 = arith.constant 0 : index
      %c0_91 = arith.constant 0 : index
      %235 = vector.load %arg3[%c0_90, %c0_91] : memref<5x32xf32, #tpu.memory_space<vmem>>, vector<1x32xf32>
      %c8 = arith.constant 8 : index
      %c0_92 = arith.constant 0 : index
      %236 = vector.load %arg20[%c8, %c0_92] : memref<16x32xf32, #tpu.memory_space<vmem>>, vector<1x32xf32>
      tpu.vector_store %arg20[%c8, %c0_92], %235 {strides = array<i32>} : memref<16x32xf32, #tpu.memory_space<vmem>>, vector<1x32xf32>,
      %237 = vector.extract_strided_slice %226 {offsets = [4, 0], sizes = [4, 32], strides = [1, 1]} : vector<8x32xf32> to vector<4x32xf32>
      %c1_93 = arith.constant 1 : index
      %c0_94 = arith.constant 0 : index
      %238 = vector.load %arg3[%c1_93, %c0_94] : memref<5x32xf32, #tpu.memory_space<vmem>>, vector<4x32xf32>
      %239 = arith.addf %237, %238 : vector<4x32xf32>
      %c9 = arith.constant 9 : index
      %c0_95 = arith.constant 0 : index
      %240 = vector.load %arg20[%c9, %c0_95] : memref<16x32xf32, #tpu.memory_space<vmem>>, vector<4x32xf32>
      tpu.vector_store %arg20[%c9, %c0_95], %239 {strides = array<i32>} : memref<16x32xf32, #tpu.memory_space<vmem>>, vector<4x32xf32>,
      %c0_96 = arith.constant 0 : index
      %c0_97 = arith.constant 0 : index
      %241 = vector.load %arg20[%c0_96, %c0_97] : memref<16x32xf32, #tpu.memory_space<vmem>>, vector<16x32xf32>
      %c0_98 = arith.constant 0 : index
      %c0_99 = arith.constant 0 : index
      %242 = vector.load %arg4[%c0_98, %c0_99] : memref<2x32xf32, #tpu.memory_space<vmem>>, vector<1x32xf32>
      %c1_100 = arith.constant 1 : index
      %c0_101 = arith.constant 0 : index
      %243 = vector.load %arg4[%c1_100, %c0_101] : memref<2x32xf32, #tpu.memory_space<vmem>>, vector<1x32xf32>
      %cst_102 = arith.constant dense<0.000000e+00> : vector<16xf32>
      %244 = vector.multi_reduction <add>, %241, %cst_102 [1] : vector<16x32xf32> to vector<16xf32>
      %245 = vector.shape_cast %244 : vector<16xf32> to vector<16x1xf32>
      %cst_103 = arith.constant 3.200000e+01 : f32
      %246 = vector.broadcast %cst_103 : f32 to vector<16x1xf32>
      %247 = arith.divf %245, %246 : vector<16x1xf32>
      %248 = vector.broadcast %247 : vector<16x1xf32> to vector<16x32xf32>
      %249 = arith.subf %241, %248 : vector<16x32xf32>
      %250 = arith.mulf %249, %249 : vector<16x32xf32>
      %cst_104 = arith.constant dense<0.000000e+00> : vector<16xf32>
      %251 = vector.multi_reduction <add>, %250, %cst_104 [1] : vector<16x32xf32> to vector<16xf32>
      %252 = vector.shape_cast %251 : vector<16xf32> to vector<16x1xf32>
      %cst_105 = arith.constant 3.200000e+01 : f32
      %253 = vector.broadcast %cst_105 : f32 to vector<16x1xf32>
      %254 = arith.divf %252, %253 : vector<16x1xf32>
      %cst_106 = arith.constant 9.99999974E-6 : f32
      %255 = vector.broadcast %cst_106 : f32 to vector<16x1xf32>
      %256 = arith.addf %254, %255 : vector<16x1xf32>
      %257 = math.rsqrt %256 : vector<16x1xf32>
      %258 = vector.broadcast %257 : vector<16x1xf32> to vector<16x32xf32>
      %259 = arith.mulf %249, %258 : vector<16x32xf32>
      %260 = vector.broadcast %242 : vector<1x32xf32> to vector<16x32xf32>
      %261 = arith.mulf %259, %260 : vector<16x32xf32>
      %262 = vector.broadcast %243 : vector<1x32xf32> to vector<16x32xf32>
      %263 = arith.addf %261, %262 : vector<16x32xf32>
      %264 = arith.mulf %263, %13 : vector<16x32xf32>
      %c0_107 = arith.constant 0 : index
      %c0_108 = arith.constant 0 : index
      %265 = vector.load %arg20[%c0_107, %c0_108] : memref<16x32xf32, #tpu.memory_space<vmem>>, vector<16x32xf32>
      tpu.vector_store %arg20[%c0_107, %c0_108], %264 {strides = array<i32>} : memref<16x32xf32, #tpu.memory_space<vmem>>, vector<16x32xf32>,
    } else {
    }
    %c0 = arith.constant 0 : index
    %c0_5 = arith.constant 0 : index
    %17 = vector.load %arg20[%c0, %c0_5] : memref<16x32xf32, #tpu.memory_space<vmem>>, vector<16x32xf32>
    %c0_6 = arith.constant 0 : index
    %c0_7 = arith.constant 0 : index
    %c0_8 = arith.constant 0 : index
    %18 = vector.load %arg5[%c0_6, %c0_7, %c0_8] : memref<1x2x32xf32, #tpu.memory_space<vmem>>, vector<1x2x32xf32>
    %19 = vector.shape_cast %18 : vector<1x2x32xf32> to vector<2x32xf32>
    %20 = vector.extract_strided_slice %19 {offsets = [0, 0], sizes = [1, 32], strides = [1, 1]} : vector<2x32xf32> to vector<1x32xf32>
    %21 = vector.extract_strided_slice %19 {offsets = [1, 0], sizes = [1, 32], strides = [1, 1]} : vector<2x32xf32> to vector<1x32xf32>
    %cst_9 = arith.constant dense<0.000000e+00> : vector<16xf32>
    %22 = vector.multi_reduction <add>, %17, %cst_9 [1] : vector<16x32xf32> to vector<16xf32>
    %23 = vector.shape_cast %22 : vector<16xf32> to vector<16x1xf32>
    %cst_10 = arith.constant 3.200000e+01 : f32
    %24 = vector.broadcast %cst_10 : f32 to vector<16x1xf32>
    %25 = arith.divf %23, %24 : vector<16x1xf32>
    %26 = vector.broadcast %25 : vector<16x1xf32> to vector<16x32xf32>
    %27 = arith.subf %17, %26 : vector<16x32xf32>
    %28 = arith.mulf %27, %27 : vector<16x32xf32>
    %cst_11 = arith.constant dense<0.000000e+00> : vector<16xf32>
    %29 = vector.multi_reduction <add>, %28, %cst_11 [1] : vector<16x32xf32> to vector<16xf32>
    %30 = vector.shape_cast %29 : vector<16xf32> to vector<16x1xf32>
    %cst_12 = arith.constant 3.200000e+01 : f32
    %31 = vector.broadcast %cst_12 : f32 to vector<16x1xf32>
    %32 = arith.divf %30, %31 : vector<16x1xf32>
    %cst_13 = arith.constant 9.99999974E-6 : f32
    %33 = vector.broadcast %cst_13 : f32 to vector<16x1xf32>
    %34 = arith.addf %32, %33 : vector<16x1xf32>
    %35 = math.rsqrt %34 : vector<16x1xf32>
    %36 = vector.broadcast %35 : vector<16x1xf32> to vector<16x32xf32>
    %37 = arith.mulf %27, %36 : vector<16x32xf32>
    %38 = vector.broadcast %20 : vector<1x32xf32> to vector<16x32xf32>
    %39 = arith.mulf %37, %38 : vector<16x32xf32>
    %40 = vector.broadcast %21 : vector<1x32xf32> to vector<16x32xf32>
    %41 = arith.addf %39, %40 : vector<16x32xf32>
    %42 = arith.truncf %41 : vector<16x32xf32> to vector<16x32xbf16>
    %c0_14 = arith.constant 0 : index
    %c0_15 = arith.constant 0 : index
    %c0_16 = arith.constant 0 : index
    %43 = vector.load %arg6[%c0_14, %c0_15, %c0_16] : memref<1x32x96xbf16, #tpu.memory_space<vmem>>, vector<1x32x96xbf16>
    %44 = vector.shape_cast %43 : vector<1x32x96xbf16> to vector<32x96xbf16>
    %cst_17 = arith.constant dense<0.000000e+00> : vector<16x96xf32>
    %45 = tpu.matmul %42, %44, %cst_17 {dimension_numbers = #tpu.dot_dimension_numbers<[1], [0], [0], [1], [0, 0, 1, 1], [], []>} : vector<16x32xbf16>, vector<32x96xbf16>, vector<16x96xf32> -> vector<16x96xf32>
    %c0_18 = arith.constant 0 : index
    %c0_19 = arith.constant 0 : index
    %c0_20 = arith.constant 0 : index
    %46 = vector.load %arg7[%c0_18, %c0_19, %c0_20] : memref<1x1x96xf32, #tpu.memory_space<vmem>>, vector<1x1x96xf32>
    %47 = vector.shape_cast %46 : vector<1x1x96xf32> to vector<1x96xf32>
    %48 = vector.broadcast %47 : vector<1x96xf32> to vector<16x96xf32>
    %49 = arith.addf %45, %48 : vector<16x96xf32>
    %50 = vector.extract_strided_slice %49 {offsets = [0, 0], sizes = [16, 8], strides = [1, 1]} : vector<16x96xf32> to vector<16x8xf32>
    %51 = vector.shape_cast %50 : vector<16x8xf32> to vector<2x8x8xf32>
    %52 = arith.truncf %51 : vector<2x8x8xf32> to vector<2x8x8xbf16>
    %53 = vector.extract_strided_slice %49 {offsets = [0, 32], sizes = [16, 8], strides = [1, 1]} : vector<16x96xf32> to vector<16x8xf32>
    %54 = vector.shape_cast %53 : vector<16x8xf32> to vector<2x8x8xf32>
    %55 = arith.truncf %54 : vector<2x8x8xf32> to vector<2x8x8xbf16>
    %56 = vector.extract_strided_slice %49 {offsets = [0, 64], sizes = [16, 8], strides = [1, 1]} : vector<16x96xf32> to vector<16x8xf32>
    %57 = vector.shape_cast %56 : vector<16x8xf32> to vector<2x8x8xf32>
    %58 = arith.truncf %57 : vector<2x8x8xf32> to vector<2x8x8xbf16>
    "tpu.trace_start"() <{level = 10 : i32, message = "bqd,bkd->bqk"}> : () -> ()
    %cst_21 = arith.constant dense<0.000000e+00> : vector<2x8x8xf32>
    %59 = tpu.matmul %52, %55, %cst_21 {dimension_numbers = #tpu.dot_dimension_numbers<[2], [2], [1], [1], [0, 0, 0, 1, 1, 1], [0], [0]>} : vector<2x8x8xbf16>, vector<2x8x8xbf16>, vector<2x8x8xf32> -> vector<2x8x8xf32>
    "tpu.trace_stop"() : () -> ()
    %cst_22 = arith.constant 0.353553385 : f32
    %60 = vector.broadcast %cst_22 : f32 to vector<2x8x8xf32>
    %61 = arith.mulf %59, %60 : vector<2x8x8xf32>
    %62 = vector.shape_cast %5 : vector<8x8xf32> to vector<1x8x8xf32>
    %63 = vector.broadcast %62 : vector<1x8x8xf32> to vector<2x8x8xf32>
    %64 = arith.addf %61, %63 : vector<2x8x8xf32>
    %cst_23 = arith.constant dense<0xFF800000> : vector<2x8xf32>
    %65 = vector.multi_reduction <maximumf>, %64, %cst_23 [2] : vector<2x8x8xf32> to vector<2x8xf32>
    %66 = vector.shape_cast %65 : vector<2x8xf32> to vector<2x8x1xf32>
    %67 = vector.broadcast %66 : vector<2x8x1xf32> to vector<2x8x8xf32>
    %68 = arith.subf %64, %67 : vector<2x8x8xf32>
    %69 = math.exp %68 : vector<2x8x8xf32>
    %cst_24 = arith.constant dense<0.000000e+00> : vector<2x8xf32>
    %70 = vector.multi_reduction <add>, %69, %cst_24 [2] : vector<2x8x8xf32> to vector<2x8xf32>
    %71 = vector.shape_cast %70 : vector<2x8xf32> to vector<2x8x1xf32>
    %72 = tpu.reciprocal %71 {approx = true} : vector<2x8x1xf32> -> vector<2x8x1xf32>
    %73 = vector.broadcast %72 : vector<2x8x1xf32> to vector<2x8x8xf32>
    %74 = arith.mulf %69, %73 : vector<2x8x8xf32>
    %75 = arith.truncf %74 : vector<2x8x8xf32> to vector<2x8x8xbf16>
    "tpu.trace_start"() <{level = 10 : i32, message = "bqk,bkd->bqd"}> : () -> ()
    %cst_25 = arith.constant dense<0.000000e+00> : vector<2x8x8xf32>
    %76 = tpu.matmul %75, %58, %cst_25 {dimension_numbers = #tpu.dot_dimension_numbers<[2], [1], [1], [2], [0, 0, 0, 1, 1, 2], [0], [0]>} : vector<2x8x8xbf16>, vector<2x8x8xbf16>, vector<2x8x8xf32> -> vector<2x8x8xf32>
    "tpu.trace_stop"() : () -> ()
    %77 = vector.extract_strided_slice %49 {offsets = [0, 8], sizes = [16, 8], strides = [1, 1]} : vector<16x96xf32> to vector<16x8xf32>
    %78 = vector.shape_cast %77 : vector<16x8xf32> to vector<2x8x8xf32>
    %79 = arith.truncf %78 : vector<2x8x8xf32> to vector<2x8x8xbf16>
    %80 = vector.extract_strided_slice %49 {offsets = [0, 40], sizes = [16, 8], strides = [1, 1]} : vector<16x96xf32> to vector<16x8xf32>
    %81 = vector.shape_cast %80 : vector<16x8xf32> to vector<2x8x8xf32>
    %82 = arith.truncf %81 : vector<2x8x8xf32> to vector<2x8x8xbf16>
    %83 = vector.extract_strided_slice %49 {offsets = [0, 72], sizes = [16, 8], strides = [1, 1]} : vector<16x96xf32> to vector<16x8xf32>
    %84 = vector.shape_cast %83 : vector<16x8xf32> to vector<2x8x8xf32>
    %85 = arith.truncf %84 : vector<2x8x8xf32> to vector<2x8x8xbf16>
    "tpu.trace_start"() <{level = 10 : i32, message = "bqd,bkd->bqk"}> : () -> ()
    %cst_26 = arith.constant dense<0.000000e+00> : vector<2x8x8xf32>
    %86 = tpu.matmul %79, %82, %cst_26 {dimension_numbers = #tpu.dot_dimension_numbers<[2], [2], [1], [1], [0, 0, 0, 1, 1, 1], [0], [0]>} : vector<2x8x8xbf16>, vector<2x8x8xbf16>, vector<2x8x8xf32> -> vector<2x8x8xf32>
    "tpu.trace_stop"() : () -> ()
    %cst_27 = arith.constant 0.353553385 : f32
    %87 = vector.broadcast %cst_27 : f32 to vector<2x8x8xf32>
    %88 = arith.mulf %86, %87 : vector<2x8x8xf32>
    %89 = vector.shape_cast %5 : vector<8x8xf32> to vector<1x8x8xf32>
    %90 = vector.broadcast %89 : vector<1x8x8xf32> to vector<2x8x8xf32>
    %91 = arith.addf %88, %90 : vector<2x8x8xf32>
    %cst_28 = arith.constant dense<0xFF800000> : vector<2x8xf32>
    %92 = vector.multi_reduction <maximumf>, %91, %cst_28 [2] : vector<2x8x8xf32> to vector<2x8xf32>
    %93 = vector.shape_cast %92 : vector<2x8xf32> to vector<2x8x1xf32>
    %94 = vector.broadcast %93 : vector<2x8x1xf32> to vector<2x8x8xf32>
    %95 = arith.subf %91, %94 : vector<2x8x8xf32>
    %96 = math.exp %95 : vector<2x8x8xf32>
    %cst_29 = arith.constant dense<0.000000e+00> : vector<2x8xf32>
    %97 = vector.multi_reduction <add>, %96, %cst_29 [2] : vector<2x8x8xf32> to vector<2x8xf32>
    %98 = vector.shape_cast %97 : vector<2x8xf32> to vector<2x8x1xf32>
    %99 = tpu.reciprocal %98 {approx = true} : vector<2x8x1xf32> -> vector<2x8x1xf32>
    %100 = vector.broadcast %99 : vector<2x8x1xf32> to vector<2x8x8xf32>
    %101 = arith.mulf %96, %100 : vector<2x8x8xf32>
    %102 = arith.truncf %101 : vector<2x8x8xf32> to vector<2x8x8xbf16>
    "tpu.trace_start"() <{level = 10 : i32, message = "bqk,bkd->bqd"}> : () -> ()
    %cst_30 = arith.constant dense<0.000000e+00> : vector<2x8x8xf32>
    %103 = tpu.matmul %102, %85, %cst_30 {dimension_numbers = #tpu.dot_dimension_numbers<[2], [1], [1], [2], [0, 0, 0, 1, 1, 2], [0], [0]>} : vector<2x8x8xbf16>, vector<2x8x8xbf16>, vector<2x8x8xf32> -> vector<2x8x8xf32>
    "tpu.trace_stop"() : () -> ()
    %104 = vector.extract_strided_slice %49 {offsets = [0, 16], sizes = [16, 8], strides = [1, 1]} : vector<16x96xf32> to vector<16x8xf32>
    %105 = vector.shape_cast %104 : vector<16x8xf32> to vector<2x8x8xf32>
    %106 = arith.truncf %105 : vector<2x8x8xf32> to vector<2x8x8xbf16>
    %107 = vector.extract_strided_slice %49 {offsets = [0, 48], sizes = [16, 8], strides = [1, 1]} : vector<16x96xf32> to vector<16x8xf32>
    %108 = vector.shape_cast %107 : vector<16x8xf32> to vector<2x8x8xf32>
    %109 = arith.truncf %108 : vector<2x8x8xf32> to vector<2x8x8xbf16>
    %110 = vector.extract_strided_slice %49 {offsets = [0, 80], sizes = [16, 8], strides = [1, 1]} : vector<16x96xf32> to vector<16x8xf32>
    %111 = vector.shape_cast %110 : vector<16x8xf32> to vector<2x8x8xf32>
    %112 = arith.truncf %111 : vector<2x8x8xf32> to vector<2x8x8xbf16>
    "tpu.trace_start"() <{level = 10 : i32, message = "bqd,bkd->bqk"}> : () -> ()
    %cst_31 = arith.constant dense<0.000000e+00> : vector<2x8x8xf32>
    %113 = tpu.matmul %106, %109, %cst_31 {dimension_numbers = #tpu.dot_dimension_numbers<[2], [2], [1], [1], [0, 0, 0, 1, 1, 1], [0], [0]>} : vector<2x8x8xbf16>, vector<2x8x8xbf16>, vector<2x8x8xf32> -> vector<2x8x8xf32>
    "tpu.trace_stop"() : () -> ()
    %cst_32 = arith.constant 0.353553385 : f32
    %114 = vector.broadcast %cst_32 : f32 to vector<2x8x8xf32>
    %115 = arith.mulf %113, %114 : vector<2x8x8xf32>
    %116 = vector.shape_cast %5 : vector<8x8xf32> to vector<1x8x8xf32>
    %117 = vector.broadcast %116 : vector<1x8x8xf32> to vector<2x8x8xf32>
    %118 = arith.addf %115, %117 : vector<2x8x8xf32>
    %cst_33 = arith.constant dense<0xFF800000> : vector<2x8xf32>
    %119 = vector.multi_reduction <maximumf>, %118, %cst_33 [2] : vector<2x8x8xf32> to vector<2x8xf32>
    %120 = vector.shape_cast %119 : vector<2x8xf32> to vector<2x8x1xf32>
    %121 = vector.broadcast %120 : vector<2x8x1xf32> to vector<2x8x8xf32>
    %122 = arith.subf %118, %121 : vector<2x8x8xf32>
    %123 = math.exp %122 : vector<2x8x8xf32>
    %cst_34 = arith.constant dense<0.000000e+00> : vector<2x8xf32>
    %124 = vector.multi_reduction <add>, %123, %cst_34 [2] : vector<2x8x8xf32> to vector<2x8xf32>
    %125 = vector.shape_cast %124 : vector<2x8xf32> to vector<2x8x1xf32>
    %126 = tpu.reciprocal %125 {approx = true} : vector<2x8x1xf32> -> vector<2x8x1xf32>
    %127 = vector.broadcast %126 : vector<2x8x1xf32> to vector<2x8x8xf32>
    %128 = arith.mulf %123, %127 : vector<2x8x8xf32>
    %129 = arith.truncf %128 : vector<2x8x8xf32> to vector<2x8x8xbf16>
    "tpu.trace_start"() <{level = 10 : i32, message = "bqk,bkd->bqd"}> : () -> ()
    %cst_35 = arith.constant dense<0.000000e+00> : vector<2x8x8xf32>
    %130 = tpu.matmul %129, %112, %cst_35 {dimension_numbers = #tpu.dot_dimension_numbers<[2], [1], [1], [2], [0, 0, 0, 1, 1, 2], [0], [0]>} : vector<2x8x8xbf16>, vector<2x8x8xbf16>, vector<2x8x8xf32> -> vector<2x8x8xf32>
    "tpu.trace_stop"() : () -> ()
    %131 = vector.extract_strided_slice %49 {offsets = [0, 24], sizes = [16, 8], strides = [1, 1]} : vector<16x96xf32> to vector<16x8xf32>
    %132 = vector.shape_cast %131 : vector<16x8xf32> to vector<2x8x8xf32>
    %133 = arith.truncf %132 : vector<2x8x8xf32> to vector<2x8x8xbf16>
    %134 = vector.extract_strided_slice %49 {offsets = [0, 56], sizes = [16, 8], strides = [1, 1]} : vector<16x96xf32> to vector<16x8xf32>
    %135 = vector.shape_cast %134 : vector<16x8xf32> to vector<2x8x8xf32>
    %136 = arith.truncf %135 : vector<2x8x8xf32> to vector<2x8x8xbf16>
    %137 = vector.extract_strided_slice %49 {offsets = [0, 88], sizes = [16, 8], strides = [1, 1]} : vector<16x96xf32> to vector<16x8xf32>
    %138 = vector.shape_cast %137 : vector<16x8xf32> to vector<2x8x8xf32>
    %139 = arith.truncf %138 : vector<2x8x8xf32> to vector<2x8x8xbf16>
    "tpu.trace_start"() <{level = 10 : i32, message = "bqd,bkd->bqk"}> : () -> ()
    %cst_36 = arith.constant dense<0.000000e+00> : vector<2x8x8xf32>
    %140 = tpu.matmul %133, %136, %cst_36 {dimension_numbers = #tpu.dot_dimension_numbers<[2], [2], [1], [1], [0, 0, 0, 1, 1, 1], [0], [0]>} : vector<2x8x8xbf16>, vector<2x8x8xbf16>, vector<2x8x8xf32> -> vector<2x8x8xf32>
    "tpu.trace_stop"() : () -> ()
    %cst_37 = arith.constant 0.353553385 : f32
    %141 = vector.broadcast %cst_37 : f32 to vector<2x8x8xf32>
    %142 = arith.mulf %140, %141 : vector<2x8x8xf32>
    %143 = vector.shape_cast %5 : vector<8x8xf32> to vector<1x8x8xf32>
    %144 = vector.broadcast %143 : vector<1x8x8xf32> to vector<2x8x8xf32>
    %145 = arith.addf %142, %144 : vector<2x8x8xf32>
    %cst_38 = arith.constant dense<0xFF800000> : vector<2x8xf32>
    %146 = vector.multi_reduction <maximumf>, %145, %cst_38 [2] : vector<2x8x8xf32> to vector<2x8xf32>
    %147 = vector.shape_cast %146 : vector<2x8xf32> to vector<2x8x1xf32>
    %148 = vector.broadcast %147 : vector<2x8x1xf32> to vector<2x8x8xf32>
    %149 = arith.subf %145, %148 : vector<2x8x8xf32>
    %150 = math.exp %149 : vector<2x8x8xf32>
    %cst_39 = arith.constant dense<0.000000e+00> : vector<2x8xf32>
    %151 = vector.multi_reduction <add>, %150, %cst_39 [2] : vector<2x8x8xf32> to vector<2x8xf32>
    %152 = vector.shape_cast %151 : vector<2x8xf32> to vector<2x8x1xf32>
    %153 = tpu.reciprocal %152 {approx = true} : vector<2x8x1xf32> -> vector<2x8x1xf32>
    %154 = vector.broadcast %153 : vector<2x8x1xf32> to vector<2x8x8xf32>
    %155 = arith.mulf %150, %154 : vector<2x8x8xf32>
    %156 = arith.truncf %155 : vector<2x8x8xf32> to vector<2x8x8xbf16>
    "tpu.trace_start"() <{level = 10 : i32, message = "bqk,bkd->bqd"}> : () -> ()
    %cst_40 = arith.constant dense<0.000000e+00> : vector<2x8x8xf32>
    %157 = tpu.matmul %156, %139, %cst_40 {dimension_numbers = #tpu.dot_dimension_numbers<[2], [1], [1], [2], [0, 0, 0, 1, 1, 2], [0], [0]>} : vector<2x8x8xbf16>, vector<2x8x8xbf16>, vector<2x8x8xf32> -> vector<2x8x8xf32>
    "tpu.trace_stop"() : () -> ()
    %158 = tpu.concatenate %76, %103, %130, %157 in 2 : vector<2x8x8xf32>, vector<2x8x8xf32>, vector<2x8x8xf32>, vector<2x8x8xf32> -> vector<2x8x32xf32>
    %159 = vector.shape_cast %158 : vector<2x8x32xf32> to vector<16x32xf32>
    %160 = arith.truncf %159 : vector<16x32xf32> to vector<16x32xbf16>
    %c0_41 = arith.constant 0 : index
    %c0_42 = arith.constant 0 : index
    %c0_43 = arith.constant 0 : index
    %161 = vector.load %arg8[%c0_41, %c0_42, %c0_43] : memref<1x32x32xbf16, #tpu.memory_space<vmem>>, vector<1x32x32xbf16>
    %162 = vector.shape_cast %161 : vector<1x32x32xbf16> to vector<32x32xbf16>
    %cst_44 = arith.constant dense<0.000000e+00> : vector<16x32xf32>
    %163 = tpu.matmul %160, %162, %cst_44 {dimension_numbers = #tpu.dot_dimension_numbers<[1], [0], [0], [1], [0, 0, 1, 1], [], []>} : vector<16x32xbf16>, vector<32x32xbf16>, vector<16x32xf32> -> vector<16x32xf32>
    %164 = arith.addf %17, %163 : vector<16x32xf32>
    %c0_45 = arith.constant 0 : index
    %c0_46 = arith.constant 0 : index
    %c0_47 = arith.constant 0 : index
    %165 = vector.load %arg9[%c0_45, %c0_46, %c0_47] : memref<1x1x32xf32, #tpu.memory_space<vmem>>, vector<1x1x32xf32>
    %166 = vector.shape_cast %165 : vector<1x1x32xf32> to vector<1x32xf32>
    %167 = vector.broadcast %166 : vector<1x32xf32> to vector<16x32xf32>
    %168 = arith.addf %164, %167 : vector<16x32xf32>
    %c0_48 = arith.constant 0 : index
    %c0_49 = arith.constant 0 : index
    %c0_50 = arith.constant 0 : index
    %169 = vector.load %arg10[%c0_48, %c0_49, %c0_50] : memref<1x2x32xf32, #tpu.memory_space<vmem>>, vector<1x2x32xf32>
    %170 = vector.shape_cast %169 : vector<1x2x32xf32> to vector<2x32xf32>
    %171 = vector.extract_strided_slice %170 {offsets = [0, 0], sizes = [1, 32], strides = [1, 1]} : vector<2x32xf32> to vector<1x32xf32>
    %172 = vector.extract_strided_slice %170 {offsets = [1, 0], sizes = [1, 32], strides = [1, 1]} : vector<2x32xf32> to vector<1x32xf32>
    %cst_51 = arith.constant dense<0.000000e+00> : vector<16xf32>
    %173 = vector.multi_reduction <add>, %168, %cst_51 [1] : vector<16x32xf32> to vector<16xf32>
    %174 = vector.shape_cast %173 : vector<16xf32> to vector<16x1xf32>
    %cst_52 = arith.constant 3.200000e+01 : f32
    %175 = vector.broadcast %cst_52 : f32 to vector<16x1xf32>
    %176 = arith.divf %174, %175 : vector<16x1xf32>
    %177 = vector.broadcast %176 : vector<16x1xf32> to vector<16x32xf32>
    %178 = arith.subf %168, %177 : vector<16x32xf32>
    %179 = arith.mulf %178, %178 : vector<16x32xf32>
    %cst_53 = arith.constant dense<0.000000e+00> : vector<16xf32>
    %180 = vector.multi_reduction <add>, %179, %cst_53 [1] : vector<16x32xf32> to vector<16xf32>
    %181 = vector.shape_cast %180 : vector<16xf32> to vector<16x1xf32>
    %cst_54 = arith.constant 3.200000e+01 : f32
    %182 = vector.broadcast %cst_54 : f32 to vector<16x1xf32>
    %183 = arith.divf %181, %182 : vector<16x1xf32>
    %cst_55 = arith.constant 9.99999974E-6 : f32
    %184 = vector.broadcast %cst_55 : f32 to vector<16x1xf32>
    %185 = arith.addf %183, %184 : vector<16x1xf32>
    %186 = math.rsqrt %185 : vector<16x1xf32>
    %187 = vector.broadcast %186 : vector<16x1xf32> to vector<16x32xf32>
    %188 = arith.mulf %178, %187 : vector<16x32xf32>
    %189 = vector.broadcast %171 : vector<1x32xf32> to vector<16x32xf32>
    %190 = arith.mulf %188, %189 : vector<16x32xf32>
    %191 = vector.broadcast %172 : vector<1x32xf32> to vector<16x32xf32>
    %192 = arith.addf %190, %191 : vector<16x32xf32>
    %193 = arith.truncf %192 : vector<16x32xf32> to vector<16x32xbf16>
    %c0_56 = arith.constant 0 : index
    %c0_57 = arith.constant 0 : index
    %c0_58 = arith.constant 0 : index
    %194 = vector.load %arg11[%c0_56, %c0_57, %c0_58] : memref<1x32x128xbf16, #tpu.memory_space<vmem>>, vector<1x32x128xbf16>
    %195 = vector.shape_cast %194 : vector<1x32x128xbf16> to vector<32x128xbf16>
    %cst_59 = arith.constant dense<0.000000e+00> : vector<16x128xf32>
    %196 = tpu.matmul %193, %195, %cst_59 {dimension_numbers = #tpu.dot_dimension_numbers<[1], [0], [0], [1], [0, 0, 1, 1], [], []>} : vector<16x32xbf16>, vector<32x128xbf16>, vector<16x128xf32> -> vector<16x128xf32>
    %c0_60 = arith.constant 0 : index
    %c0_61 = arith.constant 0 : index
    %c0_62 = arith.constant 0 : index
    %197 = vector.load %arg12[%c0_60, %c0_61, %c0_62] : memref<1x1x128xf32, #tpu.memory_space<vmem>>, vector<1x1x128xf32>
    %198 = vector.shape_cast %197 : vector<1x1x128xf32> to vector<1x128xf32>
    %199 = vector.broadcast %198 : vector<1x128xf32> to vector<16x128xf32>
    %200 = arith.addf %196, %199 : vector<16x128xf32>
    %cst_63 = arith.constant 1.702000e+00 : f32
    %201 = vector.broadcast %cst_63 : f32 to vector<16x128xf32>
    %202 = arith.mulf %201, %200 : vector<16x128xf32>
    %203 = arith.negf %202 : vector<16x128xf32>
    %204 = math.exp %203 : vector<16x128xf32>
    %cst_64 = arith.constant 1.000000e+00 : f32
    %205 = vector.broadcast %cst_64 : f32 to vector<16x128xf32>
    %206 = arith.addf %205, %204 : vector<16x128xf32>
    %207 = arith.divf %205, %206 : vector<16x128xf32>
    %208 = arith.mulf %200, %207 : vector<16x128xf32>
    %209 = arith.truncf %208 : vector<16x128xf32> to vector<16x128xbf16>
    %c0_65 = arith.constant 0 : index
    %c0_66 = arith.constant 0 : index
    %c0_67 = arith.constant 0 : index
    %210 = vector.load %arg13[%c0_65, %c0_66, %c0_67] : memref<1x128x32xbf16, #tpu.memory_space<vmem>>, vector<1x128x32xbf16>
    %211 = vector.shape_cast %210 : vector<1x128x32xbf16> to vector<128x32xbf16>
    %cst_68 = arith.constant dense<0.000000e+00> : vector<16x32xf32>
    %212 = tpu.matmul %209, %211, %cst_68 {dimension_numbers = #tpu.dot_dimension_numbers<[1], [0], [0], [1], [0, 0, 1, 1], [], []>} : vector<16x128xbf16>, vector<128x32xbf16>, vector<16x32xf32> -> vector<16x32xf32>
    %213 = arith.addf %168, %212 : vector<16x32xf32>
    %c0_69 = arith.constant 0 : index
    %c0_70 = arith.constant 0 : index
    %c0_71 = arith.constant 0 : index
    %214 = vector.load %arg14[%c0_69, %c0_70, %c0_71] : memref<1x1x32xf32, #tpu.memory_space<vmem>>, vector<1x1x32xf32>
    %215 = vector.shape_cast %214 : vector<1x1x32xf32> to vector<1x32xf32>
    %216 = vector.broadcast %215 : vector<1x32xf32> to vector<16x32xf32>
    %217 = arith.addf %213, %216 : vector<16x32xf32>
    %218 = arith.mulf %217, %13 : vector<16x32xf32>
    %c0_72 = arith.constant 0 : index
    %c0_73 = arith.constant 0 : index
    %219 = vector.load %arg20[%c0_72, %c0_73] : memref<16x32xf32, #tpu.memory_space<vmem>>, vector<16x32xf32>
    tpu.vector_store %arg20[%c0_72, %c0_73], %218 {strides = array<i32>} : memref<16x32xf32, #tpu.memory_space<vmem>>, vector<16x32xf32>,
    %c1_i32 = arith.constant 1 : i32
    %220 = arith.cmpi eq, %arg0, %c1_i32 : i32
    %221 = arith.extui %220 : i1 to i32
    %c0_i32_74 = arith.constant 0 : i32
    %222 = arith.cmpi ne, %221, %c0_i32_74 : i32
    scf.if %222 {
      %223 = vector.extract_strided_slice %218 {offsets = [0, 0], sizes = [1, 32], strides = [1, 1]} : vector<16x32xf32> to vector<1x32xf32>
      %224 = vector.extract_strided_slice %218 {offsets = [8, 0], sizes = [1, 32], strides = [1, 1]} : vector<16x32xf32> to vector<1x32xf32>
      %225 = tpu.concatenate %223, %224 in 0 : vector<1x32xf32>, vector<1x32xf32> -> vector<2x32xf32>
      %c0_75 = arith.constant 0 : index
      %c0_76 = arith.constant 0 : index
      %226 = vector.load %arg15[%c0_75, %c0_76] : memref<2x32xf32, #tpu.memory_space<vmem>>, vector<1x32xf32>
      %c1 = arith.constant 1 : index
      %c0_77 = arith.constant 0 : index
      %227 = vector.load %arg15[%c1, %c0_77] : memref<2x32xf32, #tpu.memory_space<vmem>>, vector<1x32xf32>
      %cst_78 = arith.constant dense<0.000000e+00> : vector<2xf32>
      %228 = vector.multi_reduction <add>, %225, %cst_78 [1] : vector<2x32xf32> to vector<2xf32>
      %229 = vector.shape_cast %228 : vector<2xf32> to vector<2x1xf32>
      %cst_79 = arith.constant 3.200000e+01 : f32
      %230 = vector.broadcast %cst_79 : f32 to vector<2x1xf32>
      %231 = arith.divf %229, %230 : vector<2x1xf32>
      %232 = vector.broadcast %231 : vector<2x1xf32> to vector<2x32xf32>
      %233 = arith.subf %225, %232 : vector<2x32xf32>
      %234 = arith.mulf %233, %233 : vector<2x32xf32>
      %cst_80 = arith.constant dense<0.000000e+00> : vector<2xf32>
      %235 = vector.multi_reduction <add>, %234, %cst_80 [1] : vector<2x32xf32> to vector<2xf32>
      %236 = vector.shape_cast %235 : vector<2xf32> to vector<2x1xf32>
      %cst_81 = arith.constant 3.200000e+01 : f32
      %237 = vector.broadcast %cst_81 : f32 to vector<2x1xf32>
      %238 = arith.divf %236, %237 : vector<2x1xf32>
      %cst_82 = arith.constant 9.99999974E-6 : f32
      %239 = vector.broadcast %cst_82 : f32 to vector<2x1xf32>
      %240 = arith.addf %238, %239 : vector<2x1xf32>
      %241 = math.rsqrt %240 : vector<2x1xf32>
      %242 = vector.broadcast %241 : vector<2x1xf32> to vector<2x32xf32>
      %243 = arith.mulf %233, %242 : vector<2x32xf32>
      %244 = vector.broadcast %226 : vector<1x32xf32> to vector<2x32xf32>
      %245 = arith.mulf %243, %244 : vector<2x32xf32>
      %246 = vector.broadcast %227 : vector<1x32xf32> to vector<2x32xf32>
      %247 = arith.addf %245, %246 : vector<2x32xf32>
      %248 = arith.truncf %247 : vector<2x32xf32> to vector<2x32xbf16>
      %c0_83 = arith.constant 0 : index
      %c0_84 = arith.constant 0 : index
      %249 = vector.load %arg16[%c0_83, %c0_84] : memref<32x16xbf16, #tpu.memory_space<vmem>>, vector<32x16xbf16>
      %cst_85 = arith.constant dense<0.000000e+00> : vector<2x16xf32>
      %250 = tpu.matmul %248, %249, %cst_85 {dimension_numbers = #tpu.dot_dimension_numbers<[1], [0], [0], [1], [0, 0, 1, 1], [], []>} : vector<2x32xbf16>, vector<32x16xbf16>, vector<2x16xf32> -> vector<2x16xf32>
      %c0_86 = arith.constant 0 : index
      %c0_87 = arith.constant 0 : index
      %251 = vector.load %arg17[%c0_86, %c0_87] : memref<4x32xf32, #tpu.memory_space<vmem>>, vector<1x32xf32>
      %c1_88 = arith.constant 1 : index
      %c0_89 = arith.constant 0 : index
      %252 = vector.load %arg17[%c1_88, %c0_89] : memref<4x32xf32, #tpu.memory_space<vmem>>, vector<1x32xf32>
      %c2 = arith.constant 2 : index
      %c0_90 = arith.constant 0 : index
      %253 = vector.load %arg17[%c2, %c0_90] : memref<4x32xf32, #tpu.memory_space<vmem>>, vector<1x32xf32>
      %c3 = arith.constant 3 : index
      %c0_91 = arith.constant 0 : index
      %254 = vector.load %arg17[%c3, %c0_91] : memref<4x32xf32, #tpu.memory_space<vmem>>, vector<1x32xf32>
      %c0_92 = arith.constant 0 : index
      %c0_93 = arith.constant 0 : index
      %255 = vector.load %arg18[%c0_92, %c0_93] : memref<4x16xf32, #tpu.memory_space<vmem>>, vector<1x16xf32>
      %c1_94 = arith.constant 1 : index
      %c0_95 = arith.constant 0 : index
      %256 = vector.load %arg18[%c1_94, %c0_95] : memref<4x16xf32, #tpu.memory_space<vmem>>, vector<1x16xf32>
      %c2_96 = arith.constant 2 : index
      %c0_97 = arith.constant 0 : index
      %257 = vector.load %arg18[%c2_96, %c0_97] : memref<4x16xf32, #tpu.memory_space<vmem>>, vector<1x16xf32>
      %c3_98 = arith.constant 3 : index
      %c0_99 = arith.constant 0 : index
      %258 = vector.load %arg18[%c3_98, %c0_99] : memref<4x16xf32, #tpu.memory_space<vmem>>, vector<1x16xf32>
      %259 = vector.broadcast %253 : vector<1x32xf32> to vector<2x32xf32>
      %260 = arith.subf %247, %259 : vector<2x32xf32>
      %cst_100 = arith.constant 9.99999974E-6 : f32
      %261 = vector.broadcast %cst_100 : f32 to vector<1x32xf32>
      %262 = arith.addf %254, %261 : vector<1x32xf32>
      %263 = math.rsqrt %262 : vector<1x32xf32>
      %264 = vector.broadcast %263 : vector<1x32xf32> to vector<2x32xf32>
      %265 = arith.mulf %260, %264 : vector<2x32xf32>
      %266 = vector.broadcast %251 : vector<1x32xf32> to vector<2x32xf32>
      %267 = arith.mulf %265, %266 : vector<2x32xf32>
      %268 = vector.broadcast %252 : vector<1x32xf32> to vector<2x32xf32>
      %269 = arith.addf %267, %268 : vector<2x32xf32>
      %270 = vector.broadcast %257 : vector<1x16xf32> to vector<2x16xf32>
      %271 = arith.subf %250, %270 : vector<2x16xf32>
      %cst_101 = arith.constant 9.99999974E-6 : f32
      %272 = vector.broadcast %cst_101 : f32 to vector<1x16xf32>
      %273 = arith.addf %258, %272 : vector<1x16xf32>
      %274 = math.rsqrt %273 : vector<1x16xf32>
      %275 = vector.broadcast %274 : vector<1x16xf32> to vector<2x16xf32>
      %276 = arith.mulf %271, %275 : vector<2x16xf32>
      %277 = vector.broadcast %255 : vector<1x16xf32> to vector<2x16xf32>
      %278 = arith.mulf %276, %277 : vector<2x16xf32>
      %279 = vector.broadcast %256 : vector<1x16xf32> to vector<2x16xf32>
      %280 = arith.addf %278, %279 : vector<2x16xf32>
      %281 = tpu.concatenate %269, %280 in 1 : vector<2x32xf32>, vector<2x16xf32> -> vector<2x48xf32>
      %282 = arith.mulf %281, %281 : vector<2x48xf32>
      %cst_102 = arith.constant dense<0.000000e+00> : vector<2xf32>
      %283 = vector.multi_reduction <add>, %282, %cst_102 [1] : vector<2x48xf32> to vector<2xf32>
      %284 = vector.shape_cast %283 : vector<2xf32> to vector<2x1xf32>
      %cst_103 = arith.constant 1.000000e-24 : f32
      %285 = vector.broadcast %cst_103 : f32 to vector<2x1xf32>
      %286 = arith.maximumf %284, %285 : vector<2x1xf32>
      %287 = math.rsqrt %286 : vector<2x1xf32>
      %288 = vector.broadcast %287 : vector<2x1xf32> to vector<2x48xf32>
      %289 = arith.mulf %281, %288 : vector<2x48xf32>
      %c0_104 = arith.constant 0 : index
      %c0_105 = arith.constant 0 : index
      %290 = vector.load %arg19[%c0_104, %c0_105] : memref<2x48xf32, #tpu.memory_space<vmem>>, vector<2x48xf32>
      tpu.vector_store %arg19[%c0_104, %c0_105], %289 {strides = array<i32>} : memref<2x48xf32, #tpu.memory_space<vmem>>, vector<2x48xf32>,
    } else {
    }
    return
  }
  func.func @transform_0(%arg0: i32) -> (i32, i32) {
    %c0_i32 = arith.constant 0 : i32
    %c0_i32_0 = arith.constant 0 : i32
    %c0_i32_1 = arith.constant 0 : i32
    return %c0_i32, %c0_i32_0 : i32, i32
  }
  func.func @transform_1(%arg0: i32) -> (i32, i32) {
    %c0_i32 = arith.constant 0 : i32
    %c0_i32_0 = arith.constant 0 : i32
    %c0_i32_1 = arith.constant 0 : i32
    return %c0_i32, %c0_i32_0 : i32, i32
  }
  func.func @transform_2(%arg0: i32) -> (i32, i32) {
    %c0_i32 = arith.constant 0 : i32
    %c0_i32_0 = arith.constant 0 : i32
    %c0_i32_1 = arith.constant 0 : i32
    return %c0_i32, %c0_i32_0 : i32, i32
  }
  func.func @transform_3(%arg0: i32) -> (i32, i32) {
    %c0_i32 = arith.constant 0 : i32
    %c0_i32_0 = arith.constant 0 : i32
    %c0_i32_1 = arith.constant 0 : i32
    return %c0_i32, %c0_i32_0 : i32, i32
  }
  func.func @transform_4(%arg0: i32) -> (i32, i32, i32) {
    %c0_i32 = arith.constant 0 : i32
    %c0_i32_0 = arith.constant 0 : i32
    %c0_i32_1 = arith.constant 0 : i32
    return %arg0, %c0_i32, %c0_i32_0 : i32, i32, i32
  }
  func.func @transform_5(%arg0: i32) -> (i32, i32, i32) {
    %c0_i32 = arith.constant 0 : i32
    %c0_i32_0 = arith.constant 0 : i32
    %c0_i32_1 = arith.constant 0 : i32
    return %arg0, %c0_i32, %c0_i32_0 : i32, i32, i32
  }
  func.func @transform_6(%arg0: i32) -> (i32, i32, i32) {
    %c0_i32 = arith.constant 0 : i32
    %c0_i32_0 = arith.constant 0 : i32
    %c0_i32_1 = arith.constant 0 : i32
    return %arg0, %c0_i32, %c0_i32_0 : i32, i32, i32
  }
  func.func @transform_7(%arg0: i32) -> (i32, i32, i32) {
    %c0_i32 = arith.constant 0 : i32
    %c0_i32_0 = arith.constant 0 : i32
    %c0_i32_1 = arith.constant 0 : i32
    return %arg0, %c0_i32, %c0_i32_0 : i32, i32, i32
  }
  func.func @transform_8(%arg0: i32) -> (i32, i32, i32) {
    %c0_i32 = arith.constant 0 : i32
    %c0_i32_0 = arith.constant 0 : i32
    %c0_i32_1 = arith.constant 0 : i32
    return %arg0, %c0_i32, %c0_i32_0 : i32, i32, i32
  }
  func.func @transform_9(%arg0: i32) -> (i32, i32, i32) {
    %c0_i32 = arith.constant 0 : i32
    %c0_i32_0 = arith.constant 0 : i32
    %c0_i32_1 = arith.constant 0 : i32
    return %arg0, %c0_i32, %c0_i32_0 : i32, i32, i32
  }
  func.func @transform_10(%arg0: i32) -> (i32, i32, i32) {
    %c0_i32 = arith.constant 0 : i32
    %c0_i32_0 = arith.constant 0 : i32
    %c0_i32_1 = arith.constant 0 : i32
    return %arg0, %c0_i32, %c0_i32_0 : i32, i32, i32
  }
  func.func @transform_11(%arg0: i32) -> (i32, i32, i32) {
    %c0_i32 = arith.constant 0 : i32
    %c0_i32_0 = arith.constant 0 : i32
    %c0_i32_1 = arith.constant 0 : i32
    return %arg0, %c0_i32, %c0_i32_0 : i32, i32, i32
  }
  func.func @transform_12(%arg0: i32) -> (i32, i32, i32) {
    %c0_i32 = arith.constant 0 : i32
    %c0_i32_0 = arith.constant 0 : i32
    %c0_i32_1 = arith.constant 0 : i32
    return %arg0, %c0_i32, %c0_i32_0 : i32, i32, i32
  }
  func.func @transform_13(%arg0: i32) -> (i32, i32, i32) {
    %c0_i32 = arith.constant 0 : i32
    %c0_i32_0 = arith.constant 0 : i32
    %c0_i32_1 = arith.constant 0 : i32
    return %arg0, %c0_i32, %c0_i32_0 : i32, i32, i32
  }
  func.func @transform_14(%arg0: i32) -> (i32, i32) {
    %c0_i32 = arith.constant 0 : i32
    %c0_i32_0 = arith.constant 0 : i32
    %c0_i32_1 = arith.constant 0 : i32
    return %c0_i32, %c0_i32_0 : i32, i32
  }
  func.func @transform_15(%arg0: i32) -> (i32, i32) {
    %c0_i32 = arith.constant 0 : i32
    %c0_i32_0 = arith.constant 0 : i32
    %c0_i32_1 = arith.constant 0 : i32
    return %c0_i32, %c0_i32_0 : i32, i32
  }
  func.func @transform_16(%arg0: i32) -> (i32, i32) {
    %c0_i32 = arith.constant 0 : i32
    %c0_i32_0 = arith.constant 0 : i32
    %c0_i32_1 = arith.constant 0 : i32
    return %c0_i32, %c0_i32_0 : i32, i32
  }
  func.func @transform_17(%arg0: i32) -> (i32, i32) {
    %c0_i32 = arith.constant 0 : i32
    %c0_i32_0 = arith.constant 0 : i32
    %c0_i32_1 = arith.constant 0 : i32
    return %c0_i32, %c0_i32_0 : i32, i32
  }
  func.func @transform_18(%arg0: i32) -> (i32, i32) {
    %c0_i32 = arith.constant 0 : i32
    %c0_i32_0 = arith.constant 0 : i32
    %c0_i32_1 = arith.constant 0 : i32
    return %c0_i32, %c0_i32_0 : i32, i32
  }
}

</mosaic_0001>

<bundles_post_ra>
// kernel: transreid_forward.1
= control target key start
LH: loop header
LB: loop body
LE: loop exit
PB: predicated region body
PF: predicated region fallthrough
CT: control target
= control target key end

     0   :  { %s3638_s0 = inlined_call_operand.vmem [shape: f32[8,192], index: 0, kind: input, shape index: {}]   ;;  %s3639_s1 = inlined_call_operand.vmem [shape: bf16[192,32], index: 1, kind: input, shape index: {}]   ;;  %s3640_s2 = inlined_call_operand.vmem [shape: f32[5,32], index: 2, kind: input, shape index: {}]   ;;  %s3641_s3 = inlined_call_operand.vmem [shape: f32[2,32], index: 3, kind: input, shape index: {}]   ;;  %s3642_s4 = inlined_call_operand.vmem [shape: f32[2,2,32], index: 4, kind: input, shape index: {}]   ;;  %s3643_s5 = inlined_call_operand.vmem [shape: bf16[2,32,96], index: 5, kind: input, shape index: {}]   ;;  %s3644_s6 = inlined_call_operand.vmem [shape: f32[2,1,96], index: 6, kind: input, shape index: {}]   ;;  %s3645_s7 = inlined_call_operand.vmem [shape: bf16[2,32,32], index: 7, kind: input, shape index: {}]   ;;  %s3646_s8 = inlined_call_operand.vmem [shape: f32[2,1,32], index: 8, kind: input, shape index: {}]   ;;  %s3647_s9 = inlined_call_operand.vmem [shape: f32[2,2,32], index: 9, kind: input, shape index: {}]   ;;  %s3648_s10 = inlined_call_operand.vmem [shape: bf16[2,32,128], index: 10, kind: input, shape index: {}]   ;;  %s3649_s11 = inlined_call_operand.vmem [shape: f32[2,1,128], index: 11, kind: input, shape index: {}]   ;;  %s3650_s12 = inlined_call_operand.vmem [shape: bf16[2,128,32], index: 12, kind: input, shape index: {}]   ;;  %s3651_s13 = inlined_call_operand.vmem [shape: f32[2,1,32], index: 13, kind: input, shape index: {}]   ;;  %s3652_s14 = inlined_call_operand.vmem [shape: f32[2,32], index: 14, kind: input, shape index: {}]   ;;  %s3653_s15 = inlined_call_operand.vmem [shape: bf16[32,16], index: 15, kind: input, shape index: {}]   ;;  %s3654_s16 = inlined_call_operand.vmem [shape: f32[4,32], index: 16, kind: input, shape index: {}]   ;;  %s3655_s17 = inlined_call_operand.vmem [shape: f32[4,16], index: 17, kind: input, shape index: {}]   ;;  %s3656_s18 = inlined_call_operand.hbm [shape: f32[2,48], index: 18, kind: output, shape index: {}]  }
   0x1   :  { %3661 = sst [smem:[#allocation7_spill]] %s3638_s0 }
   0x2   :  { %3662 = sst [smem:[#allocation8_spill]] %s3639_s1 }
   0x3   :  { %3663 = sst [smem:[#allocation9_spill]] %s3640_s2 }
   0x4   :  { %3664 = sst [smem:[#allocation10_spill]] %s3642_s4 }
   0x5   :  { %3665 = sst [smem:[#allocation11_spill]] %s3643_s5 }
   0x6   :  { %3666 = sst [smem:[#allocation12_spill]] %s3645_s7 }
   0x7   :  { %3667 = sst [smem:[#allocation13_spill]] %s3647_s9 }
   0x8   :  { %3668 = sst [smem:[#allocation14_spill]] %s3656_s18 }
   0x9   :  { %23 = vsyncpa [#allocation4], 0  ;;  %s3184_s27 = smov 0  }
   0xa LB: > { %3669 = sst [smem:[#allocation6_spill]] %s3064_s27  ;;  %s3190_s28 = sadd.s32 4294967295, %s3064_s27   ;;  %s3064_s27 = sphi %s3184_s27, %s29_s27  }
   0xb   : > { %p2603_p0 = scmp.ge.s32.totalorder %s3064_s27, 1  ;;  %p588_p1 = scmp.lt.s32.totalorder %s3064_s27, 3 }
   0xd   : > { %p589_p2 = pnand %p2603_p0, %p588_p1 }
   0xe   : > { %p672_p3 = scmp.lt.s32.totalorder (!%p589_p2), %s3190_s28, 1  ;;  %s3670_s4 = sld [smem:[#allocation10_spill]] (!%p589_p2) }
   0xf   : > { %592 = sbr.rel (%p589_p2) target bundleno = 5389 (0x150d), region = 92  ;;  %s3671_s5 = sld [smem:[#allocation11_spill]] (!%p589_p2) }
  0x10   : > { %s3672_s7 = sld [smem:[#allocation12_spill]] (!%p589_p2)  ;;  %p2614_p4 = scmp.ne.s32.totalorder (!%p589_p2), %s3190_s28, 0 }
  0x11   : > { %s3673_s9 = sld [smem:[#allocation13_spill]] (!%p589_p2) }
  0x14   : > { %v713_v0 = vlaneseq  ;;  %s3196_s29 = scalar_select %p672_p3, %s3190_s28, 1  ;;  %v3066_v5 = vmov -1e+30   ;;  %v3067_v8 = vmov 0.0  }
  0x15   : > { %s3674_s23 = sld [smem:[#allocation8_spill]] (!%p2614_p4) }
  0x16   : > { %v714_v1 = vand.u32 127, %v713_v0  ;;  %v3198_v2 = vshrl.u32 %v713_v0, 7  ;;  %s2604_s30 = sshll.u32 %s3196_s29, 1  ;;  %s2685_s0 = sshll.u32 %s3196_s29, 4 }
  0x17   : > { %s3207_s20 = scalar_lea.vmem %s3670_s4, %s2604_s30  ;;  %s3212_s2 = scalar_lea.vmem %s3671_s5, %s2685_s0 }
  0x18   : > { %vm715_vm0 = vcmp.lt.s32.totalorder %v714_v1, 5  ;;  %v719_v3 = vadd.s32 8, %v3198_v2  ;;  %v720_v4 = vand.u32 7, %v3198_v2  ;;  %s3223_s19 = scalar_lea.vmem %s3672_s7, %s2685_s0  ;;  %s3232_s18 = scalar_lea.vmem %s3673_s9, %s2604_s30 }
  0x19   : > { %v3214_v6 = vsel %vm715_vm0, 0.0, %v3066_v5  ;;  %s3240_s27 = scalar_lea.vmem %s3648_s10, %s2685_s0  ;;  %s703_s7 = scalar_lea.vmem %s3649_s11, %s3196_s29 }
  0x1a   : > { %v721_v7 = vand.u32 7, %v719_v3  ;;  %vm722_vm1 = vcmp.lt.s32.totalorder %v720_v4, 5  ;;  %s2688_s4 = sshll.u32 %s3196_s29, 6  ;;  %729 = sbr.rel (%p2614_p4) target bundleno = 598 (0x256), region = 96 }
  0x1b   : > { %v3235_v9 = vsel %vm722_vm1, 1.0, %v3067_v8  ;;  %s3257_s9 = scalar_lea.vmem %s3650_s12, %s2688_s4  ;;  %s3675_s25 = sld [smem:[#allocation7_spill]] (!%p2614_p4) }
  0x1c   : > { %vm723_vm2 = vcmp.lt.s32.totalorder %v721_v7, 5  ;;  %s3676_s5 = sld [smem:[#allocation9_spill]] (!%p2614_p4) }
  0x1d   : > { %v3252_v10 = vsel %vm723_vm2, 1.0, %v3067_v8 }
  0x1f   : > { %v2927_v11 = vld [vmem:[%s3674_s23 + $0x38] sm:$0xff]   ;;  %v3068_v12 = vmov 0   ;;  %v2928_v13 = vld [vmem:[%s3674_s23 + $0x30] sm:$0xff]   ;;  %v2929_v14 = vld [vmem:[%s3674_s23 + $0x28] sm:$0xff]   ;;  %vm830_vm3 = vcmask 523264   ;;  %vm874_vm4 = vcmask 261120  }
  0x20   : > { %834 = vmatprep.subr.bf16.mxu0 %v3068_v12  ;;  %v2930_v15 = vld [vmem:[%s3674_s23 + $0x20] sm:$0xff]   ;;  %v2931_v18 = vld [vmem:[%s3674_s23 + $0x18] sm:$0xff]   ;;  %v2932_v19 = vld [vmem:[%s3674_s23 + $0x10] sm:$0xff]   ;;  %vm878_vm5 = vcmask 253952   ;;  %v3069_v29 = vmov 0.0   ;;  %vm882_vm6 = vcmask 257024  }
  0x21   : > { %835 = vmatpush1.bf16.msra.mxu0 %v2927_v11  ;;  %v731_v16 = vld [vmem:[%s3675_s25 + $0x8] sm:$0xff]  ;;  %v2934_v21 = vld [vmem:[%s3674_s23] sm:$0xff]   ;;  %v2935_v22 = vld [vmem:[%s3674_s23 + $0x58] sm:$0xff]   ;;  %875 = vst.msk [vmem:[#allocation2] sm:$0xff] %vm874_vm4, %v3069_v29  ;;  %vm891_vm7 = vcmask 261124  }
  0x22   : > { %836 = vmatprep.subr.bf16.mxu0 %v3068_v12  ;;  %v733_v17 = vpack.c.bf16 %v731_v16, %v731_v16  ;;  %v2933_v20 = vld [vmem:[%s3674_s23 + $0x8] sm:$0xff]   ;;  %v2936_v23 = vld [vmem:[%s3674_s23 + $0x50] sm:$0xff]   ;;  %v2938_v25 = vld [vmem:[%s3674_s23 + $0x40] sm:$0xff]   ;;  %876 = vst.msk [vmem:[#allocation2 + $0x8] sm:$0xff] %vm874_vm4, %v3069_v29 }
  0x23   : > { %v2937_v24 = vld [vmem:[%s3674_s23 + $0x48] sm:$0xff]   ;;  %v730_v26 = vld [vmem:[%s3675_s25] sm:$0xff] }
  0x24   : > { %2627 = vmatprep.mubr.msk.bf16.mxu0 %vm830_vm3, %v733_v17  ;;  %v732_v27 = vpack.c.bf16 %v730_v26, %v730_v26  ;;  %v877_v28 = vld [vmem:[%s3676_s5] sm:$0x1]  ;;  %v886_v31 = vld [vmem:[%s3676_s5 + $0x1] sm:$0xf] }
  0x25   : > { %837 = vmatpush1.bf16.msra.mxu0 %v2928_v13  ;;  %879 = vst.msk [vmem:[#allocation2] sm:$0x1] %vm878_vm5, %v877_v28  ;;  %v884_v30 = vld [vmem:[%s3676_s5] sm:$0x1]  ;;  %v888_v32 = vrot.slane %v886_v31, 4 }
  0x26   : > { %838 = vmatprep.subr.bf16.mxu0 %v3068_v12  ;;  %885 = vst.msk [vmem:[#allocation2 + $0x8] sm:$0x1] %vm878_vm5, %v884_v30  ;;  %v880_v33 = vld [vmem:[%s3676_s5 + $0x1] sm:$0xf]  ;;  %v2628_v61 = vld [vmem:[%s3641_s3] ss:$0 sm:$0xff] }
  0x27   : > { %v2629_v63 = vld [vmem:[%s3641_s3 + $0x1] ss:$0 sm:$0xff] }
  0x29   : > { %839 = vmatpush1.bf16.msra.mxu0 %v2929_v14 }
  0x2a   : > { %840 = vmatprep.subr.bf16.mxu0 %v3068_v12 }
  0x2d   : > { %841 = vmatpush1.bf16.msra.mxu0 %v2930_v15 }
  0x2e   : > { %842 = vmatprep.subr.bf16.mxu0 %v3068_v12 }
  0x31   : > { %843 = vmatpush1.bf16.msra.mxu0 %v2931_v18 }
  0x32   : > { %844 = vmatprep.subr.bf16.mxu0 %v3068_v12 }
  0x35   : > { %845 = vmatpush1.bf16.msra.mxu0 %v2932_v19 }
  0x36   : > { %846 = vmatprep.subr.bf16.mxu0 %v3068_v12 }
  0x39   : > { %847 = vmatpush1.bf16.msra.mxu0 %v2933_v20 }
  0x3a   : > { %848 = vmatprep.subr.bf16.mxu0 %v3068_v12 }
  0x3d   : > { %849 = vmatpush1.bf16.msra.mxu0 %v2934_v21 }
  0x3e   : > { %858 = vmatprep.subr.bf16.mxu0 %v3068_v12 }
  0x41   : > { %859 = vmatpush2.bf16.msra.mxu0 %v2935_v22 }
  0x42   : > { %860 = vmatprep.subr.bf16.mxu0 %v3068_v12 }
  0x45   : > { %861 = vmatpush2.bf16.msra.mxu0 %v2936_v23 }
  0x46   : > { %862 = vmatprep.subr.bf16.mxu0 %v3068_v12 }
  0x49   : > { %863 = vmatpush2.bf16.msra.mxu0 %v2937_v24 }
  0x4a   : > { %864 = vmatprep.subr.bf16.mxu0 %v3068_v12 }
  0x4d   : > { %865 = vmatpush2.bf16.msra.mxu0 %v2938_v25 }
  0x50   : > { %867 = vmatmul.mubr.bf16.vlgmr.msra.gmra.mxu0 %v732_v27 }
 0x110   : > { %v868_v34 = vpop.f32.mrf.mxu0 }
 0x111   : > { %v881_v35 = vadd.f32 %v880_v33, %v868_v34  ;;  %v890_v36 = vadd.f32 %v888_v32, %v868_v34 }
 0x112   : > { %v870_v37 = vpop.f32.mrf.mxu0 }
 0x113   : > { %883 = vst.msk [vmem:[#allocation2 + $0x1] sm:$0xf] %vm882_vm6, %v881_v35 }
 0x114   : > { %892 = vst.msk [vmem:[#allocation2 + $0x5] sm:$0xf0] %vm891_vm7, %v890_v36  ;;  %v871_v38 = vpop.f32.mrf.mxu0 }
 0x116   : > { %v872_v39 = vpop.f32.mrf.mxu0 }
 0x11a   : > { %v893_v40 = vld [vmem:[#allocation2] sm:$0xff] }
 0x11b   : > { %v897_v41 = vsel %vm874_vm4, %v893_v40, 0.0  ;;  %v894_v42 = vld [vmem:[#allocation2 + $0x8] sm:$0xff] }
 0x11c   : > { %898 = vadd.xlane.f32.xlu0 %v897_v41  ;;  %v900_v43 = vsel %vm874_vm4, %v894_v42, 0.0 }
 0x120   : > { %901 = vadd.xlane.f32.xlu0 %v900_v43 }
 0x1a5   : > { %v899_v44 = vpop.xlane.xlu0 %898 }
 0x1a6   : > { %v904_v45 = vmul.f32 0.03125, %v899_v44 }
 0x1a8   : > { %v906_v46 = vsub.f32 %v893_v40, %v904_v45 }
 0x1a9   : > { %v902_v47 = vpop.xlane.xlu0 %901 }
 0x1aa   : > { %v905_v48 = vmul.f32 0.03125, %v902_v47  ;;  %v908_v49 = vmul.f32 %v906_v46, %v906_v46 }
 0x1ac   : > { %v907_v50 = vsub.f32 %v894_v42, %v905_v48  ;;  %v910_v51 = vsel %vm874_vm4, %v908_v49, 0.0 }
 0x1ad   : > { %911 = vadd.xlane.f32.xlu1 %v910_v51 }
 0x1ae   : > { %v909_v52 = vmul.f32 %v907_v50, %v907_v50 }
 0x1b0   : > { %v913_v53 = vsel %vm874_vm4, %v909_v52, 0.0 }
 0x1b1   : > { %914 = vadd.xlane.f32.xlu1 %v913_v53 }
 0x236   : > { %v912_v54 = vpop.xlane.xlu1 %911 }
 0x237   : > { %v916_v55 = vmul.f32 0.03125, %v912_v54 }
 0x239   : > { %v918_v56 = vadd.f32 1e-05, %v916_v55 }
 0x23a   : > { %v915_v57 = vpop.xlane.xlu1 %914 }
 0x23b   : > { %2939 = vrsqrt.f32 %v918_v56  ;;  %v917_v58 = vmul.f32 0.03125, %v915_v57 }
 0x23d   : > { %v919_v59 = vadd.f32 1e-05, %v917_v58 }
 0x23f   : > { %2941 = vrsqrt.f32 %v919_v59 }
 0x248   : > { %v2940_v60 = vpop.eup %2939 }
 0x249   : > { %v922_v62 = vmul.f32 %v2940_v60, %v906_v46 }
 0x24b   : > { %v928_v0 = vmul.f32 %v2628_v61, %v922_v62 }
 0x24c   : > { %v2942_v1 = vpop.eup %2941 }
 0x24d   : > { %v934_v3 = vadd.f32 %v2629_v63, %v928_v0  ;;  %v923_v4 = vmul.f32 %v2942_v1, %v907_v50 }
 0x24f   : > { %v936_v5 = vmul.f32 %v934_v3, %v3235_v9  ;;  %v929_v7 = vmul.f32 %v2628_v61, %v923_v4 }
 0x251   : > { %938 = vst.msk [vmem:[#allocation2] sm:$0xff] %vm874_vm4, %v936_v5  ;;  %v935_v11 = vadd.f32 %v2629_v63, %v929_v7 }
 0x253   : > { %v937_v12 = vmul.f32 %v935_v11, %v3252_v10 }
 0x255   : > { %939 = vst.msk [vmem:[#allocation2 + $0x8] sm:$0xff] %vm874_vm4, %v937_v12 }
 0x256 PF: > { %vm943_vm8 = vcmask 261120   ;;  %2742 = vmatprep.subr.bf16.mxu0 %v3067_v8  ;;  %2762 = vmatprep.subr.bf16.mxu1 %v3067_v8  ;;  %v2958_v27 = vld [vmem:[%s3212_s2 + $0x8] sm:$0xff]   ;;  %vm3070_vm9 = vmmov 0   ;;  %v2959_v28 = vld [vmem:[%s3212_s2] sm:$0xff]   ;;  %v3353_v35 = vsub.s32 0, %v3198_v2  ;;  %v979_v40 = vsub.s32 1, %v3198_v2  ;;  %s3677_s22 = scalar_lea.vmem %s3644_s6, %s3196_s29 }
 0x257   : > { %2746 = vmatprep.mubr.msk.bf16.mxu0 %vm3070_vm9, %v3067_v8  ;;  %2764 = vmatprep.mubr.msk.bf16.mxu1 %vm3070_vm9, %v3067_v8  ;;  %v942_v36 = vld [vmem:[%s3207_s20] sm:$0x3]  ;;  %s3071_s0 = smov 96   ;;  %vm1056_vm10 = vcmask 64512   ;;  %s3072_s21 = smov 64   ;;  %vm1185_vm11 = vcmask 1043456  }
 0x258   : > { %v3330_v13 = vld [vmem:[#allocation2] sm:$0xff]  ;;  %2743 = vmatpush3.bf16.msra.mxu0 %v2958_v27  ;;  %v974_v39 = vrot.slane %v942_v36, %v3353_v35  ;;  %v980_v44 = vrot.slane %v942_v36, %v979_v40  ;;  %s3073_s24 = smov 88   ;;  %s3074_s26 = smov 120   ;;  %vm1975_vm12 = vcmask 130048   ;;  %vm1978_vm13 = vcmask 195584   ;;  %v2965_v2 = vld [vmem:[%s3257_s9 + $0x30] sm:$0xff]  }
 0x259   : > { %v944_v15 = vsel %vm943_vm8, %v3330_v13, 0.0  ;;  %2744 = vmatprep.subr.bf16.mxu0 %v3067_v8  ;;  %v2630_v49 = vld [vmem:[%s3677_s22] ss:$0 sm:$0xff]  ;;  %s3075_s1 = smov 56   ;;  %s3076_s4 = smov 80  }
 0x25a   : > { %945 = vadd.xlane.f32.xlu0 %v944_v15  ;;  %s3077_s30 = smov 112   ;;  %s3078_s20 = smov 48  }
 0x25b   : > { %s3079_s2 = smov 72   ;;  %s3080_s22 = smov 104  }
 0x25c   : > { %v3332_v14 = vld [vmem:[#allocation2 + $0x8] sm:$0xff]  ;;  %2745 = vmatpush3.bf16.msra.mxu0 %v2959_v28  ;;  %p2669_p5 = scmp.ne.s32.totalorder %s3190_s28, 1 }
 0x25d   : > { %v947_v16 = vsel %vm943_vm8, %v3332_v14, 0.0  ;;  %2750 = vmatprep.subr.bf16.mxu0 %v3067_v8 }
 0x25e   : > { %948 = vadd.xlane.f32.xlu0 %v947_v16 }
 0x2e3   : > { %v946_v17 = vpop.xlane.xlu0 %945 }
 0x2e4   : > { %v951_v18 = vmul.f32 0.03125, %v946_v17 }
 0x2e6   : > { %v953_v19 = vsub.f32 %v3330_v13, %v951_v18 }
 0x2e7   : > { %v949_v20 = vpop.xlane.xlu0 %948 }
 0x2e8   : > { %v952_v21 = vmul.f32 0.03125, %v949_v20  ;;  %v955_v22 = vmul.f32 %v953_v19, %v953_v19 }
 0x2ea   : > { %v954_v23 = vsub.f32 %v3332_v14, %v952_v21  ;;  %v957_v24 = vsel %vm943_vm8, %v955_v22, 0.0 }
 0x2eb   : > { %958 = vadd.xlane.f32.xlu1 %v957_v24 }
 0x2ec   : > { %v956_v25 = vmul.f32 %v954_v23, %v954_v23 }
 0x2ee   : > { %v960_v26 = vsel %vm943_vm8, %v956_v25, 0.0 }
 0x2ef   : > { %961 = vadd.xlane.f32.xlu1 %v960_v26 }
 0x374   : > { %v959_v29 = vpop.xlane.xlu1 %958 }
 0x375   : > { %v963_v30 = vmul.f32 0.03125, %v959_v29 }
 0x377   : > { %v965_v31 = vadd.f32 1e-05, %v963_v30 }
 0x378   : > { %v962_v32 = vpop.xlane.xlu1 %961 }
 0x379   : > { %2972 = vrsqrt.f32 %v965_v31  ;;  %v964_v33 = vmul.f32 0.03125, %v962_v32 }
 0x37b   : > { %v966_v34 = vadd.f32 1e-05, %v964_v33 }
 0x37d   : > { %2974 = vrsqrt.f32 %v966_v34 }
 0x386   : > { %v2973_v37 = vpop.eup %2972 }
 0x387   : > { %v969_v38 = vmul.f32 %v2973_v37, %v953_v19 }
 0x389   : > { %v975_v43 = vmul.f32 %v974_v39, %v969_v38 }
 0x38a   : > { %v2975_v41 = vpop.eup %2974 }
 0x38b   : > { %v970_v42 = vmul.f32 %v2975_v41, %v954_v23  ;;  %v981_v46 = vadd.f32 %v980_v44, %v975_v43 }
 0x38d   : > { %v976_v45 = vmul.f32 %v974_v39, %v970_v42 }
 0x38f   : > { %v982_v47 = vadd.f32 %v980_v44, %v976_v45 }
 0x391   : > { %v983_v48 = vpack.c.bf16 %v982_v47, %v981_v46 }
 0x393   : > { %2747 = vmatmul.mubr.msk.bf16.vlgmr.msra.gmra.mxu0 %vm943_vm8, %v983_v48 }
 0x394   : > { %2752 = vmatprep.mubr.msk.bf16.mxu0 %vm3070_vm9, %v3067_v8 }
 0x453   : > { %v1044_v50 = vpop.f32.mrf.mxu0 }
 0x454   : > { %v1045_v51 = vadd.f32 %v2630_v49, %v1044_v50 }
 0x455   : > { %v2748_v52 = vpop.f32.mrf.mxu0 }
 0x456   : > { %v3368_v53 = vpack.c.bf16 %v1045_v51, %v1045_v51 }
 0x457   : > { %v1047_v54 = vpop.f32.mrf.mxu0 }
 0x458   : > { %v1048_v55 = vadd.f32 %v2630_v49, %v1047_v54  ;;  %1054 = vrot.lane.b32.xlu0 %v3368_v53, %s3071_s0 }
 0x459   : > { %v2749_v56 = vpop.f32.mrf.mxu0 }
 0x45a   : > { %v3371_v57 = vpack.c.bf16 %v1048_v55, %v1048_v55 }
 0x45c   : > { %1104 = vrot.lane.b32.xlu1 %v3371_v57, %s3071_s0  ;;  %s3081_s0 = smov 40  }
 0x4ca   : > { %v1055_v58 = vpop.permute.xlu0 %1054 }
 0x4cb   : > { %v1061_v59 = vsel %vm1056_vm10, %v1055_v58, 0 }
 0x4cc   : > { %2751 = vmatpush3.bf16.xpose.msra.mxu0 %v1061_v59 }
 0x4cd   : > { %2756 = vmatprep.subr.bf16.mxu0 %v3067_v8 }
 0x4ce   : > { %v1105_v60 = vpop.permute.xlu1 %1104 }
 0x4cf   : > { %v1110_v61 = vsel %vm1056_vm10, %v1105_v60, 0 }
 0x4d3   : > { %2753 = vmatmul.mubr.msk.bf16.vlgmr.msra.gmra.mxu0 %vm1056_vm10, %v3368_v53 }
 0x4d4   : > { %2757 = vmatpush3.bf16.xpose.msra.mxu0 %v1110_v61  ;;  %2758 = vmatprep.mubr.msk.bf16.mxu0 %vm3070_vm9, %v3067_v8 }
 0x4d5   : > { %2768 = vmatprep.subr.bf16.mxu0 %v3067_v8 }
 0x4db   : > { %2759 = vmatmul.mubr.msk.bf16.vlgmr.msra.gmra.mxu0 %vm1056_vm10, %v3371_v57 }
 0x4dc   : > { %2770 = vmatprep.mubr.msk.bf16.mxu0 %vm3070_vm9, %v3067_v8 }
 0x593   : > { %v1097_v62 = vpop.f32.mrf.mxu0 }
 0x594   : > { %v1152_v63 = vmul.f32 0.35355338, %v1097_v62 }
 0x595   : > { %v2754_v0 = vpop.f32.mrf.mxu0 }
 0x596   : > { %v1154_v1 = vadd.f32 %v1152_v63, %v3214_v6 }
 0x597   : > { %v1100_v3 = vpop.f32.mrf.mxu0 }
 0x598   : > { %v1156_v4 = vsel %vm1056_vm10, %v1154_v1, -inf }
 0x599   : > { %1157 = vmax.xlane.f32.xlu1 %v1156_v4  ;;  %v2755_v5 = vpop.f32.mrf.mxu0 }
 0x59b   : > { %v1146_v7 = vpop.f32.mrf.mxu0 }
 0x59c   : > { %v1153_v11 = vmul.f32 0.35355338, %v1146_v7 }
 0x59d   : > { %v2760_v12 = vpop.f32.mrf.mxu0 }
 0x59e   : > { %v1155_v15 = vadd.f32 %v1153_v11, %v3214_v6 }
 0x59f   : > { %v1149_v16 = vpop.f32.mrf.mxu0 }
 0x5a0   : > { %v1159_v17 = vsel %vm1056_vm10, %v1155_v15, -inf }
 0x5a1   : > { %1160 = vmax.xlane.f32.xlu0 %v1159_v17  ;;  %v2761_v18 = vpop.f32.mrf.mxu0 }
 0x5aa   : > { %1229 = vrot.lane.b32.xlu1 %v3371_v57, %s3072_s21 }
 0x5ae   : > { %1279 = vrot.lane.b32.xlu1 %v3368_v53, %s3073_s24 }
 0x622   : > { %v1158_v19 = vpop.xlane.xlu1 %1157 }
 0x623   : > { %v1162_v20 = vsub.f32 %v1154_v1, %v1158_v19 }
 0x625   : > { %v1164_v21 = vmul.f32 1.442695, %v1162_v20 }
 0x626   : > { %v1230_v22 = vpop.permute.xlu1 %1229 }
 0x627   : > { %2976 = vpow2.f32 %v1164_v21  ;;  %v1235_v23 = vsel %vm1185_vm11, %v1230_v22, 0 }
 0x628   : > { %2769 = vmatpush3.bf16.msra.mxu0 %v1235_v23 }
 0x629   : > { %2780 = vmatprep.subr.bf16.mxu0 %v3067_v8 }
 0x62a   : > { %v1161_v24 = vpop.xlane.xlu0 %1160  ;;  %v1280_v32 = vpop.permute.xlu1 %1279 }
 0x62b   : > { %v1163_v25 = vsub.f32 %v1155_v15, %v1161_v24  ;;  %v1285_v41 = vsel %vm1056_vm10, %v1280_v32, 0 }
 0x62d   : > { %v1166_v26 = vmul.f32 1.442695, %v1163_v25 }
 0x62f   : > { %2978 = vpow2.f32 %v1166_v26 }
 0x634   : > { %v2977_v27 = vpop.eup %2976 }
 0x635   : > { %v1168_v28 = vsel %vm1056_vm10, %v2977_v27, 0.0 }
 0x636   : > { %1169 = vadd.xlane.f32.xlu0 %v1168_v28 }
 0x63c   : > { %v2979_v29 = vpop.eup %2978 }
 0x63d   : > { %v1171_v30 = vsel %vm1056_vm10, %v2979_v29, 0.0 }
 0x63e   : > { %1172 = vadd.xlane.f32.xlu1 %v1171_v30 }
 0x64c   : > { %1180 = vrot.lane.b32.xlu0 %v3368_v53, %s3072_s21  ;;  %s3082_s21 = smov 8  }
 0x64f   : > { %1329 = vrot.lane.b32.xlu1 %v3371_v57, %s3073_s24  ;;  %s3083_s24 = smov 16  }
 0x650   : > { %1277 = vrot.lane.b32.xlu0 %v3368_v53, %s3074_s26 }
 0x653   : > { %1327 = vrot.lane.b32.xlu1 %v3371_v57, %s3074_s26  ;;  %s3084_s26 = smov 24  }
 0x6bf   : > { %v1170_v31 = vpop.xlane.xlu0 %1169 }
 0x6c0   : > { %2980 = vrcp.f32 %v1170_v31 }
 0x6c3   : > { %v1181_v33 = vpop.permute.xlu0 %1180 }
 0x6c4   : > { %v1187_v34 = vsel %vm1185_vm11, %v1181_v33, 0 }
 0x6c5   : > { %2763 = vmatpush3.bf16.msra.mxu1 %v1187_v34 }
 0x6c6   : > { %2774 = vmatprep.subr.bf16.mxu1 %v3067_v8 }
 0x6c7   : > { %v1173_v36 = vpop.xlane.xlu1 %1172  ;;  %v1278_v46 = vpop.permute.xlu0 %1277 }
 0x6c8   : > { %2982 = vrcp.f32 %v1173_v36 }
 0x6cb   : > { %v1330_v44 = vpop.permute.xlu1 %1329 }
 0x6cc   : > { %v1335_v47 = vsel %vm1056_vm10, %v1330_v44, 0 }
 0x6cd   : > { %v2981_v37 = vpop.eup %2980 }
 0x6ce   : > { %v1176_v38 = vmul.f32 %v2981_v37, %v2977_v27 }
 0x6cf   : > { %v1328_v48 = vpop.permute.xlu1 %1327 }
 0x6d0   : > { %v1178_v39 = vpack.c.bf16 %v1176_v38, %v1176_v38 }
 0x6d2   : > { %2765 = vmatmul.mubr.msk.bf16.vlgmr.msra.gmra.mxu1 %vm1056_vm10, %v1178_v39 }
 0x6d3   : > { %2775 = vmatpush3.bf16.xpose.msra.mxu1 %v1285_v41  ;;  %2776 = vmatprep.mubr.msk.bf16.mxu1 %vm3070_vm9, %v3067_v8 }
 0x6d4   : > { %2786 = vmatprep.subr.bf16.mxu1 %v3067_v8 }
 0x6d5   : > { %v2983_v42 = vpop.eup %2982 }
 0x6d6   : > { %v1177_v43 = vmul.f32 %v2983_v42, %v2979_v29 }
 0x6d8   : > { %v1179_v45 = vpack.c.bf16 %v1177_v43, %v1177_v43 }
 0x6da   : > { %2771 = vmatmul.mubr.msk.bf16.vlgmr.msra.gmra.mxu0 %vm1056_vm10, %v1179_v45  ;;  %2777 = vmatmul.mubr.msk.bf16.vlgmr.msra.gmra.mxu1 %vm1056_vm10, %v1278_v46 }
 0x6db   : > { %2781 = vmatpush3.bf16.xpose.msra.mxu0 %v1335_v47  ;;  %2782 = vmatprep.mubr.msk.bf16.mxu0 %vm3070_vm9, %v3067_v8 }
 0x6dc   : > { %2792 = vmatprep.subr.bf16.mxu0 %v3067_v8  ;;  %2788 = vmatprep.mubr.msk.bf16.mxu1 %vm3070_vm9, %v3067_v8 }
 0x6e2   : > { %2783 = vmatmul.mubr.msk.bf16.vlgmr.msra.gmra.mxu0 %vm1056_vm10, %v1328_v48 }
 0x6e3   : > { %2794 = vmatprep.mubr.msk.bf16.mxu0 %vm3070_vm9, %v3067_v8 }
 0x792   : > { %v3418_v49 = vpop.f32.mrf.mxu1 }
 0x794   : > { %v2766_v50 = vpop.f32.mrf.mxu1 }
 0x796   : > { %v1226_v51 = vpop.f32.mrf.mxu1 }
 0x798   : > { %v2767_v52 = vpop.f32.mrf.mxu1 }
 0x79a   : > { %v3420_v54 = vpop.f32.mrf.mxu0  ;;  %v1321_v55 = vpop.f32.mrf.mxu1 }
 0x79b   : > { %v1377_v56 = vmul.f32 0.35355338, %v1321_v55 }
 0x79c   : > { %v2772_v58 = vpop.f32.mrf.mxu0  ;;  %v2778_v59 = vpop.f32.mrf.mxu1 }
 0x79d   : > { %v1379_v60 = vadd.f32 %v1377_v56, %v3214_v6 }
 0x79e   : > { %v1274_v61 = vpop.f32.mrf.mxu0  ;;  %v1324_v62 = vpop.f32.mrf.mxu1 }
 0x79f   : > { %v1381_v63 = vsel %vm1056_vm10, %v1379_v60, -inf }
 0x7a0   : > { %1382 = vmax.xlane.f32.xlu0 %v1381_v63  ;;  %v2773_v0 = vpop.f32.mrf.mxu0  ;;  %v2779_v1 = vpop.f32.mrf.mxu1 }
 0x7a2   : > { %v1371_v3 = vpop.f32.mrf.mxu0 }
 0x7a3   : > { %v1378_v4 = vmul.f32 0.35355338, %v1371_v3 }
 0x7a4   : > { %v2784_v5 = vpop.f32.mrf.mxu0 }
 0x7a5   : > { %v1380_v7 = vadd.f32 %v1378_v4, %v3214_v6 }
 0x7a6   : > { %v1374_v11 = vpop.f32.mrf.mxu0 }
 0x7a7   : > { %v1384_v12 = vsel %vm1056_vm10, %v1380_v7, -inf }
 0x7a8   : > { %1385 = vmax.xlane.f32.xlu1 %v1384_v12  ;;  %v2785_v15 = vpop.f32.mrf.mxu0 }
 0x7b9   : > { %1453 = vrot.lane.b32.xlu1 %v3371_v57, %s3075_s1 }
 0x7bd   : > { %1503 = vrot.lane.b32.xlu1 %v3368_v53, %s3076_s4 }
 0x7c1   : > { %1553 = vrot.lane.b32.xlu1 %v3371_v57, %s3076_s4  ;;  %s3678_s4 = scalar_lea.vmem %s3646_s8, %s3196_s29 }
 0x7c5   : > { %1551 = vrot.lane.b32.xlu1 %v3371_v57, %s3077_s30 }
 0x829   : > { %v1383_v16 = vpop.xlane.xlu0 %1382 }
 0x82a   : > { %v1387_v17 = vsub.f32 %v1379_v60, %v1383_v16 }
 0x82c   : > { %v1389_v18 = vmul.f32 1.442695, %v1387_v17 }
 0x82e   : > { %2984 = vpow2.f32 %v1389_v18 }
 0x831   : > { %v1386_v19 = vpop.xlane.xlu1 %1385 }
 0x832   : > { %v1388_v20 = vsub.f32 %v1380_v7, %v1386_v19 }
 0x834   : > { %v1391_v21 = vmul.f32 1.442695, %v1388_v20 }
 0x835   : > { %v1454_v22 = vpop.permute.xlu1 %1453 }
 0x836   : > { %2986 = vpow2.f32 %v1391_v21  ;;  %v1459_v23 = vsel %vm1185_vm11, %v1454_v22, 0 }
 0x837   : > { %2793 = vmatpush3.bf16.msra.mxu0 %v1459_v23 }
 0x838   : > { %2804 = vmatprep.subr.bf16.mxu0 %v3067_v8 }
 0x839   : > { %v1504_v34 = vpop.permute.xlu1 %1503 }
 0x83a   : > { %v1509_v37 = vsel %vm1056_vm10, %v1504_v34, 0 }
 0x83b   : > { %v2985_v24 = vpop.eup %2984 }
 0x83c   : > { %v1393_v25 = vsel %vm1056_vm10, %v2985_v24, 0.0 }
 0x83d   : > { %1394 = vadd.xlane.f32.xlu0 %v1393_v25  ;;  %v1554_v41 = vpop.permute.xlu1 %1553 }
 0x83e   : > { %v1559_v44 = vsel %vm1056_vm10, %v1554_v41, 0 }
 0x841   : > { %v1552_v45 = vpop.permute.xlu1 %1551 }
 0x843   : > { %v2987_v26 = vpop.eup %2986 }
 0x844   : > { %v1396_v27 = vsel %vm1056_vm10, %v2987_v26, 0.0 }
 0x845   : > { %1397 = vadd.xlane.f32.xlu0 %v1396_v27 }
 0x85b   : > { %1405 = vrot.lane.b32.xlu0 %v3368_v53, %s3075_s1 }
 0x85f   : > { %1501 = vrot.lane.b32.xlu0 %v3368_v53, %s3077_s30  ;;  %s3679_s30 = scalar_lea.vmem %s3651_s13, %s3196_s29  ;;  %s3087_s29 = smov (!%p2669_p5), 32  }
 0x8c6   : > { %v1395_v28 = vpop.xlane.xlu0 %1394 }
 0x8c7   : > { %2988 = vrcp.f32 %v1395_v28 }
 0x8ce   : > { %v1398_v29 = vpop.xlane.xlu0 %1397 }
 0x8cf   : > { %2990 = vrcp.f32 %v1398_v29 }
 0x8d2   : > { %v1406_v30 = vpop.permute.xlu0 %1405 }
 0x8d3   : > { %v1411_v31 = vsel %vm1185_vm11, %v1406_v30, 0 }
 0x8d4   : > { %v2989_v32 = vpop.eup %2988  ;;  %2787 = vmatpush3.bf16.msra.mxu1 %v1411_v31 }
 0x8d5   : > { %2798 = vmatprep.subr.bf16.mxu1 %v3067_v8  ;;  %v1401_v33 = vmul.f32 %v2989_v32, %v2985_v24 }
 0x8d6   : > { %v1502_v43 = vpop.permute.xlu0 %1501 }
 0x8d7   : > { %v1403_v36 = vpack.c.bf16 %v1401_v33, %v1401_v33 }
 0x8d9   : > { %2789 = vmatmul.mubr.msk.bf16.vlgmr.msra.gmra.mxu1 %vm1056_vm10, %v1403_v36 }
 0x8da   : > { %2799 = vmatpush3.bf16.xpose.msra.mxu1 %v1509_v37  ;;  %2800 = vmatprep.mubr.msk.bf16.mxu1 %vm3070_vm9, %v3067_v8 }
 0x8db   : > { %2810 = vmatprep.subr.bf16.mxu1 %v3067_v8 }
 0x8dc   : > { %v2991_v38 = vpop.eup %2990 }
 0x8dd   : > { %v1402_v39 = vmul.f32 %v2991_v38, %v2987_v26 }
 0x8df   : > { %v1404_v42 = vpack.c.bf16 %v1402_v39, %v1402_v39 }
 0x8e1   : > { %2795 = vmatmul.mubr.msk.bf16.vlgmr.msra.gmra.mxu0 %vm1056_vm10, %v1404_v42  ;;  %2801 = vmatmul.mubr.msk.bf16.vlgmr.msra.gmra.mxu1 %vm1056_vm10, %v1502_v43 }
 0x8e2   : > { %2805 = vmatpush3.bf16.xpose.msra.mxu0 %v1559_v44  ;;  %2806 = vmatprep.mubr.msk.bf16.mxu0 %vm3070_vm9, %v3067_v8 }
 0x8e3   : > { %2816 = vmatprep.subr.bf16.mxu0 %v3067_v8  ;;  %2812 = vmatprep.mubr.msk.bf16.mxu1 %vm3070_vm9, %v3067_v8 }
 0x8e9   : > { %2807 = vmatmul.mubr.msk.bf16.vlgmr.msra.gmra.mxu0 %vm1056_vm10, %v1552_v45 }
 0x8ea   : > { %2818 = vmatprep.mubr.msk.bf16.mxu0 %vm3070_vm9, %v3067_v8 }
 0x999   : > { %v3454_v46 = vpop.f32.mrf.mxu1 }
 0x99b   : > { %v2790_v47 = vpop.f32.mrf.mxu1 }
 0x99d   : > { %v1450_v48 = vpop.f32.mrf.mxu1 }
 0x99f   : > { %v2791_v50 = vpop.f32.mrf.mxu1 }
 0x9a1   : > { %v3456_v51 = vpop.f32.mrf.mxu0  ;;  %v1545_v52 = vpop.f32.mrf.mxu1 }
 0x9a2   : > { %v2943_v55 = vpack.i.bf16 %v3456_v51, %v3454_v46  ;;  %v1601_v56 = vmul.f32 0.35355338, %v1545_v52 }
 0x9a3   : > { %v2796_v58 = vpop.f32.mrf.mxu0  ;;  %v2802_v59 = vpop.f32.mrf.mxu1 }
 0x9a4   : > { %v1603_v60 = vadd.f32 %v1601_v56, %v3214_v6 }
 0x9a5   : > { %v1498_v61 = vpop.f32.mrf.mxu0  ;;  %v1548_v62 = vpop.f32.mrf.mxu1 }
 0x9a6   : > { %v1605_v63 = vsel %vm1056_vm10, %v1603_v60, -inf }
 0x9a7   : > { %1606 = vmax.xlane.f32.xlu0 %v1605_v63  ;;  %v2797_v0 = vpop.f32.mrf.mxu0  ;;  %v2803_v1 = vpop.f32.mrf.mxu1 }
 0x9a9   : > { %v1595_v3 = vpop.f32.mrf.mxu0 }
 0x9aa   : > { %v1602_v4 = vmul.f32 0.35355338, %v1595_v3 }
 0x9ab   : > { %v2808_v5 = vpop.f32.mrf.mxu0 }
 0x9ac   : > { %v1604_v7 = vadd.f32 %v1602_v4, %v3214_v6 }
 0x9ad   : > { %v1598_v11 = vpop.f32.mrf.mxu0 }
 0x9ae   : > { %v1608_v12 = vsel %vm1056_vm10, %v1604_v7, -inf }
 0x9af   : > { %1609 = vmax.xlane.f32.xlu1 %v1608_v12  ;;  %v2809_v15 = vpop.f32.mrf.mxu0 }
 0x9c0   : > { %1677 = vrot.lane.b32.xlu1 %v3371_v57, %s3078_s20 }
 0x9c4   : > { %1727 = vrot.lane.b32.xlu1 %v3368_v53, %s3079_s2 }
 0x9c8   : > { %1777 = vrot.lane.b32.xlu1 %v3371_v57, %s3079_s2 }
 0x9cc   : > { %1775 = vrot.lane.b32.xlu1 %v3371_v57, %s3080_s22 }
 0xa30   : > { %v1607_v16 = vpop.xlane.xlu0 %1606 }
 0xa31   : > { %v1611_v17 = vsub.f32 %v1603_v60, %v1607_v16 }
 0xa33   : > { %v1613_v18 = vmul.f32 1.442695, %v1611_v17 }
 0xa35   : > { %2992 = vpow2.f32 %v1613_v18 }
 0xa38   : > { %v1610_v19 = vpop.xlane.xlu1 %1609 }
 0xa39   : > { %v1612_v20 = vsub.f32 %v1604_v7, %v1610_v19 }
 0xa3b   : > { %v1615_v21 = vmul.f32 1.442695, %v1612_v20 }
 0xa3c   : > { %v1678_v22 = vpop.permute.xlu1 %1677 }
 0xa3d   : > { %2994 = vpow2.f32 %v1615_v21  ;;  %v1683_v23 = vsel %vm1185_vm11, %v1678_v22, 0 }
 0xa3e   : > { %2817 = vmatpush3.bf16.msra.mxu0 %v1683_v23 }
 0xa3f   : > { %2828 = vmatprep.subr.bf16.mxu0 %v3067_v8 }
 0xa40   : > { %v1728_v34 = vpop.permute.xlu1 %1727 }
 0xa41   : > { %v1733_v37 = vsel %vm1056_vm10, %v1728_v34, 0 }
 0xa42   : > { %v2993_v24 = vpop.eup %2992 }
 0xa43   : > { %v1617_v25 = vsel %vm1056_vm10, %v2993_v24, 0.0 }
 0xa44   : > { %1618 = vadd.xlane.f32.xlu0 %v1617_v25  ;;  %v1778_v41 = vpop.permute.xlu1 %1777 }
 0xa45   : > { %v1783_v44 = vsel %vm1056_vm10, %v1778_v41, 0 }
 0xa48   : > { %v1776_v45 = vpop.permute.xlu1 %1775 }
 0xa4a   : > { %v2995_v26 = vpop.eup %2994 }
 0xa4b   : > { %v1620_v27 = vsel %vm1056_vm10, %v2995_v26, 0.0 }
 0xa4c   : > { %1621 = vadd.xlane.f32.xlu0 %v1620_v27 }
 0xa62   : > { %1629 = vrot.lane.b32.xlu0 %v3368_v53, %s3078_s20 }
 0xa66   : > { %1725 = vrot.lane.b32.xlu0 %v3368_v53, %s3080_s22 }
 0xacd   : > { %v1619_v28 = vpop.xlane.xlu0 %1618 }
 0xace   : > { %2996 = vrcp.f32 %v1619_v28 }
 0xad5   : > { %v1622_v29 = vpop.xlane.xlu0 %1621 }
 0xad6   : > { %2998 = vrcp.f32 %v1622_v29 }
 0xad9   : > { %v1630_v30 = vpop.permute.xlu0 %1629 }
 0xada   : > { %v1635_v31 = vsel %vm1185_vm11, %v1630_v30, 0 }
 0xadb   : > { %v2997_v32 = vpop.eup %2996  ;;  %2811 = vmatpush3.bf16.msra.mxu1 %v1635_v31 }
 0xadc   : > { %2822 = vmatprep.subr.bf16.mxu1 %v3067_v8  ;;  %v1625_v33 = vmul.f32 %v2997_v32, %v2993_v24 }
 0xadd   : > { %v1726_v43 = vpop.permute.xlu0 %1725 }
 0xade   : > { %v1627_v36 = vpack.c.bf16 %v1625_v33, %v1625_v33 }
 0xae0   : > { %2813 = vmatmul.mubr.msk.bf16.vlgmr.msra.gmra.mxu1 %vm1056_vm10, %v1627_v36  ;;  %v2960_v36 = vld [vmem:[%s3223_s19 + $0x8] sm:$0xff]  }
 0xae1   : > { %2823 = vmatpush3.bf16.xpose.msra.mxu1 %v1733_v37  ;;  %2824 = vmatprep.mubr.msk.bf16.mxu1 %vm3070_vm9, %v3067_v8  ;;  %v2961_v37 = vld [vmem:[%s3223_s19] sm:$0xff]  }
 0xae2   : > { %2834 = vmatprep.subr.bf16.mxu1 %v3067_v8 }
 0xae3   : > { %v2999_v38 = vpop.eup %2998 }
 0xae4   : > { %v1626_v39 = vmul.f32 %v2999_v38, %v2995_v26 }
 0xae6   : > { %v1628_v42 = vpack.c.bf16 %v1626_v39, %v1626_v39 }
 0xae8   : > { %2819 = vmatmul.mubr.msk.bf16.vlgmr.msra.gmra.mxu0 %vm1056_vm10, %v1628_v42  ;;  %2825 = vmatmul.mubr.msk.bf16.vlgmr.msra.gmra.mxu1 %vm1056_vm10, %v1726_v43 }
 0xae9   : > { %2829 = vmatpush3.bf16.xpose.msra.mxu0 %v1783_v44  ;;  %2830 = vmatprep.mubr.msk.bf16.mxu0 %vm3070_vm9, %v3067_v8 }
 0xaea   : > { %2840 = vmatprep.subr.bf16.mxu0 %v3067_v8  ;;  %2836 = vmatprep.mubr.msk.bf16.mxu1 %vm3070_vm9, %v3067_v8 }
 0xaf0   : > { %2831 = vmatmul.mubr.msk.bf16.vlgmr.msra.gmra.mxu0 %vm1056_vm10, %v1776_v45 }
 0xaf1   : > { %2842 = vmatprep.mubr.msk.bf16.mxu0 %vm3070_vm9, %v3067_v8 }
 0xba0   : > { %v1671_v47 = vpop.f32.mrf.mxu1 }
 0xba2   : > { %v2814_v48 = vpop.f32.mrf.mxu1 }
 0xba4   : > { %v1674_v50 = vpop.f32.mrf.mxu1 }
 0xba6   : > { %v2815_v52 = vpop.f32.mrf.mxu1 }
 0xba8   : > { %v1719_v56 = vpop.f32.mrf.mxu0  ;;  %v1769_v58 = vpop.f32.mrf.mxu1 }
 0xba9   : > { %v1825_v59 = vmul.f32 0.35355338, %v1769_v58  ;;  %v2948_v18 = vpack.i.bf16 %v1719_v56, %v1671_v47 }
 0xbaa   : > { %v2820_v60 = vpop.f32.mrf.mxu0  ;;  %v2826_v61 = vpop.f32.mrf.mxu1 }
 0xbab   : > { %v1827_v62 = vadd.f32 %v1825_v59, %v3214_v6 }
 0xbac   : > { %v1722_v63 = vpop.f32.mrf.mxu0  ;;  %v1772_v0 = vpop.f32.mrf.mxu1 }
 0xbad   : > { %v1829_v1 = vsel %vm1056_vm10, %v1827_v62, -inf }
 0xbae   : > { %1830 = vmax.xlane.f32.xlu0 %v1829_v1  ;;  %v2821_v3 = vpop.f32.mrf.mxu0  ;;  %v2827_v4 = vpop.f32.mrf.mxu1 }
 0xbb0   : > { %v1819_v5 = vpop.f32.mrf.mxu0 }
 0xbb1   : > { %v1826_v7 = vmul.f32 0.35355338, %v1819_v5 }
 0xbb2   : > { %v2832_v11 = vpop.f32.mrf.mxu0 }
 0xbb3   : > { %v1828_v12 = vadd.f32 %v1826_v7, %v3214_v6 }
 0xbb4   : > { %v1822_v15 = vpop.f32.mrf.mxu0 }
 0xbb5   : > { %v1832_v16 = vsel %vm1056_vm10, %v1828_v12, -inf }
 0xbb6   : > { %1833 = vmax.xlane.f32.xlu1 %v1832_v16  ;;  %v2833_v17 = vpop.f32.mrf.mxu0 }
 0xbc7   : > { %1901 = vrot.lane.b32.xlu1 %v3371_v57, %s3081_s0 }
 0xbcb   : > { %2944 = vrot.lane.b32.xlu1 %v2943_v55, %s3082_s21 }
 0xbcf   : > { %2949 = vrot.lane.b32.xlu1 %v2948_v18, %s3083_s24 }
 0xc37   : > { %v1831_v19 = vpop.xlane.xlu0 %1830 }
 0xc38   : > { %v1835_v20 = vsub.f32 %v1827_v62, %v1831_v19 }
 0xc3a   : > { %v1837_v21 = vmul.f32 1.442695, %v1835_v20 }
 0xc3c   : > { %3000 = vpow2.f32 %v1837_v21 }
 0xc3f   : > { %v1834_v6 = vpop.xlane.xlu1 %1833 }
 0xc40   : > { %v1836_v22 = vsub.f32 %v1828_v12, %v1834_v6 }
 0xc42   : > { %v1839_v23 = vmul.f32 1.442695, %v1836_v22 }
 0xc43   : > { %v1902_v24 = vpop.permute.xlu1 %1901 }
 0xc44   : > { %3002 = vpow2.f32 %v1839_v23  ;;  %v1907_v25 = vsel %vm1185_vm11, %v1902_v24, 0 }
 0xc45   : > { %2841 = vmatpush3.bf16.msra.mxu0 %v1907_v25 }
 0xc46   : > { %2854 = vmatprep.subr.bf16.mxu0 %v3067_v8 }
 0xc47   : > { %v2945_v50 = vpop.permute.xlu1 %2944 }
 0xc48   : > { %v2947_v56 = vunpack.i.h.bf16 %v2945_v50  ;;  %v2946_v58 = vunpack.i.l.bf16 %v2945_v50  ;;  %v2967_v50 = vld [vmem:[%s3257_s9 + $0x20] sm:$0xff]  }
 0xc49   : > { %v3001_v57 = vpop.eup %3000 }
 0xc4a   : > { %v1841_v46 = vsel %vm1056_vm10, %v3001_v57, 0.0  ;;  %v1974_v62 = vsel %vm1056_vm10, %v3420_v54, %v2947_v56  ;;  %v1973_v63 = vsel %vm1056_vm10, %v3418_v49, %v2946_v58  ;;  %v2653_v54 = vld [vmem:[%s3678_s4] ss:$0 sm:$0xff]  ;;  %v2969_v56 = vld [vmem:[%s3257_s9 + $0x10] sm:$0xff]   ;;  %v2970_v58 = vld [vmem:[%s3257_s9 + $0x8] sm:$0xff]  }
 0xc4b   : > { %1842 = vadd.xlane.f32.xlu0 %v1841_v46  ;;  %v2950_v52 = vpop.permute.xlu1 %2949 }
 0xc4c   : > { %v2952_v59 = vunpack.i.h.bf16 %v2950_v52  ;;  %v2951_v60 = vunpack.i.l.bf16 %v2950_v52  ;;  %v2968_v52 = vld [vmem:[%s3257_s9 + $0x18] sm:$0xff]  }
 0xc4e   : > { %v1976_v3 = vsel %vm1975_vm12, %v1973_v63, %v2951_v60  ;;  %v1977_v4 = vsel %vm1975_vm12, %v1974_v62, %v2952_v59  ;;  %v2971_v59 = vld [vmem:[%s3257_s9] sm:$0xff]  }
 0xc4f   : > { %v2654_v60 = vld [vmem:[%s703_s7] ss:$0 sm:$0xff] }
 0xc51   : > { %v3003_v51 = vpop.eup %3002 }
 0xc52   : > { %v1844_v55 = vsel %vm1056_vm10, %v3003_v51, 0.0 }
 0xc53   : > { %1845 = vadd.xlane.f32.xlu0 %v1844_v55 }
 0xc69   : > { %1853 = vrot.lane.b32.xlu0 %v3368_v53, %s3081_s0 }
 0xcd4   : > { %v1843_v26 = vpop.xlane.xlu0 %1842 }
 0xcd5   : > { %3004 = vrcp.f32 %v1843_v26  ;;  %v2962_v26 = vld [vmem:[%s3240_s27 + $0x8] sm:$0xff]  }
 0xcdc   : > { %v1846_v27 = vpop.xlane.xlu0 %1845 }
 0xcdd   : > { %3006 = vrcp.f32 %v1846_v27  ;;  %v2963_v27 = vld [vmem:[%s3240_s27] sm:$0xff]  }
 0xce0   : > { %v1854_v28 = vpop.permute.xlu0 %1853 }
 0xce1   : > { %v1859_v29 = vsel %vm1185_vm11, %v1854_v28, 0 }
 0xce2   : > { %v3005_v30 = vpop.eup %3004  ;;  %2835 = vmatpush3.bf16.msra.mxu1 %v1859_v29 }
 0xce3   : > { %v1849_v31 = vmul.f32 %v3005_v30, %v3001_v57  ;;  %2846 = vmatprep.subr.bf16.mxu1 %v3067_v8 }
 0xce5   : > { %v1851_v32 = vpack.c.bf16 %v1849_v31, %v1849_v31 }
 0xce7   : > { %2837 = vmatmul.mubr.msk.bf16.vlgmr.msra.gmra.mxu1 %vm1056_vm10, %v1851_v32 }
 0xce8   : > { %2850 = vmatprep.mubr.msk.bf16.mxu1 %vm3070_vm9, %v3067_v8  ;;  %2847 = vmatpush3.bf16.msra.mxu1 %v2960_v36 }
 0xce9   : > { %2848 = vmatprep.subr.bf16.mxu1 %v3067_v8 }
 0xcea   : > { %v3007_v53 = vpop.eup %3006 }
 0xceb   : > { %v1850_v33 = vmul.f32 %v3007_v53, %v3003_v51 }
 0xcec   : > { %2849 = vmatpush3.bf16.msra.mxu1 %v2961_v37 }
 0xced   : > { %v1852_v34 = vpack.c.bf16 %v1850_v33, %v1850_v33  ;;  %2862 = vmatprep.subr.bf16.mxu1 %v3067_v8  ;;  %v2053_v33 = vld [vmem:[%s3232_s18] sm:$0x3] }
 0xcee   : > { %v2089_v37 = vrot.slane %v2053_v33, %v979_v40  ;;  %v2966_v40 = vld [vmem:[%s3257_s9 + $0x28] sm:$0xff]  }
 0xcef   : > { %2843 = vmatmul.mubr.msk.bf16.vlgmr.msra.gmra.mxu0 %vm1056_vm10, %v1852_v34  ;;  %v2083_v34 = vrot.slane %v2053_v33, %v3353_v35 }
 0xcf0   : > { %2858 = vmatprep.mubr.msk.bf16.mxu0 %vm3070_vm9, %v3067_v8  ;;  %2855 = vmatpush3.bf16.msra.mxu0 %v2962_v26 }
 0xcf1   : > { %2856 = vmatprep.subr.bf16.mxu0 %v3067_v8 }
 0xcf4   : > { %2857 = vmatpush3.bf16.msra.mxu0 %v2963_v27 }
 0xda7   : > { %v1895_v38 = vpop.f32.mrf.mxu1 }
 0xda9   : > { %v2838_v39 = vpop.f32.mrf.mxu1 }
 0xdab   : > { %v1898_v41 = vpop.f32.mrf.mxu1 }
 0xdad   : > { %v2839_v42 = vpop.f32.mrf.mxu1 }
 0xdaf   : > { %v1943_v43 = vpop.f32.mrf.mxu0 }
 0xdb0   : > { %v2953_v44 = vpack.i.bf16 %v1943_v43, %v1895_v38 }
 0xdb1   : > { %v2844_v45 = vpop.f32.mrf.mxu0 }
 0xdb2   : > { %2954 = vrot.lane.b32.xlu0 %v2953_v44, %s3084_s26 }
 0xdb3   : > { %v1946_v47 = vpop.f32.mrf.mxu0 }
 0xdb5   : > { %v2845_v48 = vpop.f32.mrf.mxu0 }
 0xdb6   : > { %v2964_v48 = vld [vmem:[%s3257_s9 + $0x38] sm:$0xff]  }
 0xe24   : > { %v2955_v61 = vpop.permute.xlu0 %2954 }
 0xe25   : > { %v2957_v0 = vunpack.i.h.bf16 %v2955_v61  ;;  %v2956_v1 = vunpack.i.l.bf16 %v2955_v61 }
 0xe27   : > { %v1980_v5 = vsel %vm1978_vm13, %v1977_v4, %v2957_v0  ;;  %v1979_v7 = vsel %vm1978_vm13, %v1976_v3, %v2956_v1 }
 0xe28   : > { %v1981_v11 = vpack.c.bf16 %v1980_v5, %v1979_v7 }
 0xe2a   : > { %2851 = vmatmul.mubr.msk.bf16.vlgmr.msra.gmra.mxu1 %vm943_vm8, %v1981_v11 }
 0xe2b   : > { %2878 = vmatprep.mubr.msk.bf16.mxu1 %vm3070_vm9, %v3067_v8  ;;  %2863 = vmatpush3.bf16.msra.mxu1 %v2964_v48 }
 0xe2c   : > { %2864 = vmatprep.subr.bf16.mxu1 %v3067_v8 }
 0xe2f   : > { %2865 = vmatpush3.bf16.msra.mxu1 %v2965_v2 }
 0xe30   : > { %2866 = vmatprep.subr.bf16.mxu1 %v3067_v8 }
 0xe33   : > { %2867 = vmatpush3.bf16.msra.mxu1 %v2966_v40 }
 0xe34   : > { %2868 = vmatprep.subr.bf16.mxu1 %v3067_v8 }
 0xe37   : > { %2869 = vmatpush3.bf16.msra.mxu1 %v2967_v50 }
 0xe38   : > { %2870 = vmatprep.subr.bf16.mxu1 %v3067_v8 }
 0xe3b   : > { %2871 = vmatpush3.bf16.msra.mxu1 %v2968_v52 }
 0xe3c   : > { %2872 = vmatprep.subr.bf16.mxu1 %v3067_v8 }
 0xe3f   : > { %2873 = vmatpush3.bf16.msra.mxu1 %v2969_v56 }
 0xe40   : > { %2874 = vmatprep.subr.bf16.mxu1 %v3067_v8 }
 0xe43   : > { %2875 = vmatpush3.bf16.msra.mxu1 %v2970_v58 }
 0xe44   : > { %2876 = vmatprep.subr.bf16.mxu1 %v3067_v8 }
 0xe47   : > { %2877 = vmatpush3.bf16.msra.mxu1 %v2971_v59 }
 0xeea   : > { %v2035_v12 = vpop.f32.mrf.mxu1 }
 0xeeb   : > { %v2042_v49 = vadd.f32 %v2035_v12, %v3330_v13 }
 0xeec   : > { %v2852_v15 = vpop.f32.mrf.mxu1 }
 0xeed   : > { %v3530_v16 = vadd.f32 %v2653_v54, %v2042_v49 }
 0xeee   : > { %v2038_v17 = vpop.f32.mrf.mxu1 }
 0xeef   : > { %v2043_v18 = vadd.f32 %v2038_v17, %v3332_v14  ;;  %v2054_v19 = vsel %vm943_vm8, %v3530_v16, 0.0 }
 0xef0   : > { %2055 = vadd.xlane.f32.xlu1 %v2054_v19  ;;  %v2853_v20 = vpop.f32.mrf.mxu1 }
 0xef1   : > { %v3535_v21 = vadd.f32 %v2653_v54, %v2043_v18 }
 0xef3   : > { %v2057_v6 = vsel %vm943_vm8, %v3535_v21, 0.0 }
 0xef4   : > { %2058 = vadd.xlane.f32.xlu0 %v2057_v6 }
 0xf79   : > { %v2056_v13 = vpop.xlane.xlu1 %2055 }
 0xf7a   : > { %v2060_v22 = vmul.f32 0.03125, %v2056_v13  ;;  %v2668_v13 = vld [vmem:[%s3679_s30] ss:$0 sm:$0xff] }
 0xf7c   : > { %v2062_v23 = vsub.f32 %v3530_v16, %v2060_v22 }
 0xf7d   : > { %v2059_v24 = vpop.xlane.xlu0 %2058 }
 0xf7e   : > { %v2061_v25 = vmul.f32 0.03125, %v2059_v24  ;;  %v2064_v14 = vmul.f32 %v2062_v23, %v2062_v23 }
 0xf80   : > { %v2063_v57 = vsub.f32 %v3535_v21, %v2061_v25  ;;  %v2066_v46 = vsel %vm943_vm8, %v2064_v14, 0.0 }
 0xf81   : > { %2067 = vadd.xlane.f32.xlu0 %v2066_v46 }
 0xf82   : > { %v2065_v51 = vmul.f32 %v2063_v57, %v2063_v57 }
 0xf84   : > { %v2069_v55 = vsel %vm943_vm8, %v2065_v51, 0.0 }
 0xf85   : > { %2070 = vadd.xlane.f32.xlu0 %v2069_v55 }
0x100a   : > { %v2068_v28 = vpop.xlane.xlu0 %2067 }
0x100b   : > { %v2072_v29 = vmul.f32 0.03125, %v2068_v28 }
0x100d   : > { %v2074_v30 = vadd.f32 1e-05, %v2072_v29 }
0x100e   : > { %v2071_v31 = vpop.xlane.xlu0 %2070 }
0x100f   : > { %3008 = vrsqrt.f32 %v2074_v30  ;;  %v2073_v32 = vmul.f32 0.03125, %v2071_v31 }
0x1011   : > { %v2075_v53 = vadd.f32 1e-05, %v2073_v32 }
0x1013   : > { %3010 = vrsqrt.f32 %v2075_v53 }
0x101c   : > { %v3009_v36 = vpop.eup %3008 }
0x101d   : > { %v2078_v38 = vmul.f32 %v3009_v36, %v2062_v23 }
0x101f   : > { %v2084_v39 = vmul.f32 %v2083_v34, %v2078_v38 }
0x1020   : > { %v3011_v41 = vpop.eup %3010 }
0x1021   : > { %v2079_v42 = vmul.f32 %v3011_v41, %v2063_v57  ;;  %v2090_v43 = vadd.f32 %v2089_v37, %v2084_v39 }
0x1023   : > { %v2085_v44 = vmul.f32 %v2083_v34, %v2079_v42 }
0x1025   : > { %v2091_v45 = vadd.f32 %v2089_v37, %v2085_v44 }
0x1027   : > { %v2092_v47 = vpack.c.bf16 %v2091_v45, %v2090_v43 }
0x1029   : > { %2859 = vmatmul.mubr.msk.bf16.vlgmr.msra.gmra.mxu0 %vm943_vm8, %v2092_v47 }
0x10e9   : > { %v2153_v61 = vpop.f32.mrf.mxu0 }
0x10ea   : > { %v2154_v62 = vadd.f32 %v2654_v60, %v2153_v61 }
0x10eb   : > { %v2860_v63 = vpop.f32.mrf.mxu0 }
0x10ec   : > { %v2658_v0 = vmul.f32 -1.702, %v2154_v62 }
0x10ed   : > { %v2156_v1 = vpop.f32.mrf.mxu0 }
0x10ee   : > { %v2164_v3 = vmul.f32 1.442695, %v2658_v0  ;;  %v2157_v4 = vadd.f32 %v2654_v60, %v2156_v1 }
0x10ef   : > { %v2861_v5 = vpop.f32.mrf.mxu0 }
0x10f0   : > { %3012 = vpow2.f32 %v2164_v3  ;;  %v2659_v7 = vmul.f32 -1.702, %v2157_v4 }
0x10f2   : > { %v2166_v11 = vmul.f32 1.442695, %v2659_v7 }
0x10f4   : > { %3014 = vpow2.f32 %v2166_v11 }
0x10fd   : > { %v3013_v8 = vpop.eup %3012 }
0x10fe   : > { %v2168_v12 = vadd.f32 1.0, %v3013_v8 }
0x1100   : > { %3016 = vrcp.f32 %v2168_v12 }
0x1101   : > { %v3015_v54 = vpop.eup %3014 }
0x1102   : > { %v2169_v49 = vadd.f32 1.0, %v3015_v54 }
0x1104   : > { %3018 = vrcp.f32 %v2169_v49 }
0x110d   : > { %v3017_v15 = vpop.eup %3016 }
0x110e   : > { %v2174_v18 = vmul.f32 %v3017_v15, %v2154_v62 }
0x1111   : > { %v3019_v17 = vpop.eup %3018 }
0x1112   : > { %v2175_v19 = vmul.f32 %v3019_v17, %v2157_v4 }
0x1114   : > { %v2176_v20 = vpack.c.bf16 %v2175_v19, %v2174_v18 }
0x1116   : > { %2879 = vmatmul.mubr.bf16.vlgmr.msra.gmra.mxu1 %v2176_v20 }
0x11d6   : > { %v2275_v6 = vpop.f32.mrf.mxu1 }
0x11d7   : > { %v2282_v22 = vadd.f32 %v2275_v6, %v3530_v16 }
0x11d8   : > { %v2880_v23 = vpop.f32.mrf.mxu1 }
0x11d9   : > { %v2291_v24 = vadd.f32 %v2668_v13, %v2282_v22 }
0x11da   : > { %v2278_v25 = vpop.f32.mrf.mxu1 }
0x11db   : > { %v2293_v14 = vmul.f32 %v2291_v24, %v3235_v9  ;;  %v2283_v57 = vadd.f32 %v2278_v25, %v3535_v21 }
0x11dc   : > { %v2881_v46 = vpop.f32.mrf.mxu1 }
0x11dd   : > { %2295 = vst.msk [vmem:[#allocation2] sm:$0xff] %vm943_vm8, %v2293_v14  ;;  %v2292_v51 = vadd.f32 %v2668_v13, %v2283_v57  ;;  %2300 = sbr.rel (%p2669_p5) target bundleno = 5368 (0x14f8), region = 100 }
0x11df   : > { %v2294_v55 = vmul.f32 %v2292_v51, %v3252_v10 }
0x11e1   : > { %2296 = vst.msk [vmem:[#allocation2 + $0x8] sm:$0xff] %vm943_vm8, %v2294_v55 }
0x11e2   : > { %v2302_v26 = vrot.slane %v2294_v55, 7  ;;  %vm2304_vm14 = vcmask 1040384   ;;  %vm2308_vm15 = vcmask 254976   ;;  %v3020_v10 = vld [vmem:[%s3653_s15 + $0x8] sm:$0xff]   ;;  %v3085_v31 = vmov 0.0   ;;  %v3021_v32 = vld [vmem:[%s3653_s15] sm:$0xff]  }
0x11e3   : > { %2882 = vmatprep.subr.bf16.mxu0 %v3085_v31  ;;  %vm3086_vm0 = vmmov 0   ;;  %v2670_v37 = vld [vmem:[%s3652_s14] ss:$0 sm:$0xff]  ;;  %v2671_v39 = vld [vmem:[%s3652_s14 + $0x1] ss:$0 sm:$0xff]  ;;  %vm2450_vm1 = vcmask 386048  }
0x11e4   : > { %v2305_v16 = vsel %vm2304_vm14, %v2293_v14, %v2302_v26  ;;  %2886 = vmatprep.mubr.msk.bf16.mxu0 %vm3086_vm0, %v3085_v31  ;;  %2883 = vmatpush3.bf16.msra.mxu0 %v3020_v10  ;;  %v2399_v44 = vld [vmem:[%s3655_s17 + $0x3] sm:$0x1]  ;;  %v2678_v48 = vld [vmem:[%s3655_s17 + $0x2] ss:$0 sm:$0xff]  ;;  %v2679_v56 = vld [vmem:[%s3655_s17] ss:$0 sm:$0xff] }
0x11e5   : > { %v2309_v27 = vsel %vm2308_vm15, %v2305_v16, 0.0  ;;  %2884 = vmatprep.subr.bf16.mxu0 %v3085_v31  ;;  %v2427_v45 = vadd.f32 1e-05, %v2399_v44  ;;  %v2680_v60 = vld [vmem:[%s3655_s17 + $0x1] ss:$0 sm:$0xff] }
0x11e6   : > { %2310 = vadd.xlane.f32.xlu0 %v2309_v27  ;;  %v2395_v0 = vld [vmem:[%s3654_s16 + $0x3] sm:$0x1]  ;;  %v2675_v4 = vld [vmem:[%s3654_s16 + $0x2] ss:$0 sm:$0xff]  ;;  %v2676_v8 = vld [vmem:[%s3654_s16] ss:$0 sm:$0xff] }
0x11e7   : > { %v2405_v1 = vadd.f32 1e-05, %v2395_v0  ;;  %v2677_v54 = vld [vmem:[%s3654_s16 + $0x1] ss:$0 sm:$0xff] }
0x11e8   : > { %2885 = vmatpush3.bf16.msra.mxu0 %v3021_v32 }
0x126f   : > { %v2311_v9 = vpop.xlane.xlu0 %2310 }
0x1270   : > { %v2312_v28 = vmul.f32 0.03125, %v2311_v9 }
0x1272   : > { %v2313_v21 = vsub.f32 %v2305_v16, %v2312_v28 }
0x1274   : > { %v2314_v29 = vmul.f32 %v2313_v21, %v2313_v21 }
0x1276   : > { %v2315_v30 = vsel %vm2308_vm15, %v2314_v29, 0.0 }
0x1277   : > { %2316 = vadd.xlane.f32.xlu0 %v2315_v30 }
0x1300   : > { %v2317_v53 = vpop.xlane.xlu0 %2316 }
0x1301   : > { %v2318_v33 = vmul.f32 0.03125, %v2317_v53 }
0x1303   : > { %v2319_v34 = vadd.f32 1e-05, %v2318_v33 }
0x1305   : > { %3022 = vrsqrt.f32 %v2319_v34 }
0x1306   : > { %3024 = vrsqrt.f32 %v2427_v45 }
0x1307   : > { %3026 = vrsqrt.f32 %v2405_v1 }
0x1312   : > { %v3023_v36 = vpop.eup %3022 }
0x1313   : > { %v2321_v38 = vmul.f32 %v3023_v36, %v2313_v21  ;;  %v3025_v47 = vpop.eup %3024 }
0x1314   : > { %v2432_v2 = vrot.slane %v3025_v47, %v3353_v35  ;;  %v3027_v3 = vpop.eup %3026 }
0x1315   : > { %v2326_v41 = vmul.f32 %v2670_v37, %v2321_v38  ;;  %v2410_v7 = vrot.slane %v3027_v3, %v3353_v35 }
0x1317   : > { %v2331_v42 = vadd.f32 %v2671_v39, %v2326_v41 }
0x1319   : > { %v2332_v43 = vpack.c.bf16 %v2331_v42, %v2331_v42  ;;  %v2404_v5 = vsub.f32 %v2331_v42, %v2675_v4 }
0x131b   : > { %2887 = vmatmul.mubr.msk.bf16.vlgmr.msra.gmra.mxu0 %vm943_vm8, %v2332_v43  ;;  %v2411_v11 = vmul.f32 %v2410_v7, %v2404_v5 }
0x131d   : > { %v2416_v12 = vmul.f32 %v2676_v8, %v2411_v11 }
0x131f   : > { %v2421_v49 = vadd.f32 %v2677_v54, %v2416_v12 }
0x13db   : > { %v2386_v40 = vpop.f32.mrf.mxu0 }
0x13dc   : > { %v2426_v50 = vsub.f32 %v2386_v40, %v2678_v48 }
0x13dd   : > { %v2888_v52 = vpop.f32.mrf.mxu0 }
0x13de   : > { %v2433_v58 = vmul.f32 %v2432_v2, %v2426_v50 }
0x13df   : > { %v2389_v59 = vpop.f32.mrf.mxu0 }
0x13e0   : > { %v2438_v61 = vmul.f32 %v2679_v56, %v2433_v58 }
0x13e1   : > { %v2889_v62 = vpop.f32.mrf.mxu0 }
0x13e2   : > { %v2443_v63 = vadd.f32 %v2680_v60, %v2438_v61 }
0x13e4   : > { %2445 = vrot.lane.b32.xlu1 %v2443_v63, %s3087_s29 }
0x1456   : > { %v2446_v15 = vpop.permute.xlu1 %2445 }
0x1457   : > { %v2448_v17 = vsel %vm943_vm8, %v2421_v49, %v2446_v15 }
0x1458   : > { %v2449_v18 = vmul.f32 %v2448_v17, %v2448_v17 }
0x145a   : > { %v2451_v19 = vsel %vm2450_vm1, %v2449_v18, 0.0 }
0x145b   : > { %2452 = vadd.xlane.f32.xlu1 %v2451_v19 }
0x14e4   : > { %v2453_v20 = vpop.xlane.xlu1 %2452 }
0x14e5   : > { %v2454_v35 = vmax.f32 %v2453_v20, 1e-24 }
0x14e7   : > { %3028 = vrsqrt.f32 %v2454_v35 }
0x14f4   : > { %v3029_v6 = vpop.eup %3028 }
0x14f5   : > { %v2456_v13 = vmul.f32 %v3029_v6, %v2448_v17 }
0x14f7   : > { %2457 = vst.msk [vmem:[#allocation3] sm:$0x3] %vm2450_vm1, %v2456_v13 }
0x14f8 PF: > { %p2894_p6 = scmp.eq.s32.totalorder %s3190_s28, 1  ;;  %s3088_s1 = smov [#allocation3]  }
0x14f9   : > { %s2465_s4 = sshll.u32 %s3088_s1, 4  ;;  %s2466_s4 = int_to_ptr.vmem [resolvable:$true] %s2465_s4 }
0x14fa   : > { %s3030_s18 = scalar_lea.vmem %s2466_s4, 32  ;;  %p3037_p10 = scmp.lt.s32.totalorder %s2466_s4, %s2466_s4 }
0x14fb   : > { %p3031_p7 = scmp.ne.s32.totalorder %s2466_s4, %s3030_s18  ;;  %p3038_p11 = scmp.lt.s32.totalorder %s3030_s18, %s3030_s18 }
0x14fd   : > { %p3032_p8 = pnand %p3031_p7, %p2894_p6  ;;  %p3039_p12 = por %p3038_p11, %p3037_p10 }
0x14ff   : > { %p3033_p9 = pneg %p3032_p8 }
0x1501   : > { %p3040_p13 = pnand %p3039_p12, %p3033_p9 }
0x1503   : > { %3043 = shalt.err (!%p3040_p13)
}
0x1504   : > { %s3680_s9 = sld [smem:[#allocation14_spill]] }
0x150a   : > { %2891 = dma.vmem_to_hbm [thread:$0]  (%p2894_p6), %s2466_s4, 32, %s3680_s9, [#allocation4]  }
0x150b   : > { %3059 = dma.done.wait (%p2894_p6), [#allocation4], 32  }
0x150c   : > { %3061 = vsyncadd (%p2894_p6), [#allocation4], 4294967264 }
0x150d PF: > { %s3681_s30 = sld [smem:[#allocation6_spill]] }
0x1513   : > { %s29_s27 = sadd.s32 1, %s3681_s30  }
0x1514   : > { %p26_p0 = scmp.ge.s32.totalorder %s29_s27, 4  }
0x1516   :  { %28 = sbr.rel (!%p26_p0) target bundleno = 10 (0xa), region = 154 }
0x151b   :  { %2478 = vsyncpa [#allocation4], 1 }
0x151c   :  { %2480 = vsyncpa [#allocation4 + $0x1], 1 }

</bundles_post_ra>
